<compile_context>
chip_gen: v5e
topology: v5e:2x2
jax: 0.10.0
libtpu: 0.0.40
codegen_flags: <defaults>
</compile_context>

<pallas_src>
import functools
import numpy as np
import jax
import jax.numpy as jnp
from jax.experimental import pallas as pl
from jax.experimental.pallas import tpu as pltpu


def _round_up(n, m):
    return (n + m - 1) // m * m


def _pick_block_b(B):
    # >= 4 grid steps when possible (>= 2 per v7x TensorCore), 64..512 rows/tile.
    bb = _round_up(max(B // 4, 1), 64)
    return int(max(64, min(512, bb)))


# ------------------------------ fused kernel -------------------------------

def _dlrm_fused_kernel(*refs, n_bottom, n_top, n_emb, d_pad, g_pad, pairs, out_real):
    """Bottom MLP -> pairwise dot interaction -> top MLP for one batch tile.

    refs layout (inputs, then output):
      x, emb,
      [bottom W, bottom b] * n_bottom,
      W0_fused, b0,                       # top layer 0 (tril fold + operand fuse)
      [top W, top b] * (n_top - 2),
      W_last^T, b_last, out
    """
    x_ref, emb_ref = refs[0], refs[1]
    pos = 2
    bot = refs[pos:pos + 2 * n_bottom]; pos += 2 * n_bottom
    w0_ref, b0_ref = refs[pos], refs[pos + 1]; pos += 2
    mid = refs[pos:pos + 2 * (n_top - 2)]; pos += 2 * (n_top - 2)
    wlt_ref, bl_ref = refs[pos], refs[pos + 1]; pos += 2
    o_ref = refs[pos]

    tb = x_ref.shape[0]

    # ---- bottom MLP: bf16 MXU matmuls, f32 accumulate, ReLU, bf16 acts ----
    y = x_ref[...]
    for l in range(n_bottom):
        y = jnp.dot(y, bot[2 * l][...], preferred_element_type=jnp.float32)
        y = jnp.maximum(y + bot[2 * l + 1][...], 0.0).astype(jnp.bfloat16)
    bottom = y                                           # (tb, d_pad) bf16

    # ---- pairwise "dot" interaction on VPU/XLU (no gram matmul, no reshape) ----
    # TODO(synk): for configs with many tables (F_pad >= ~32) a batched-gram MXU
    # path would be preferable to NT individual lane reductions.
    rows = [bottom.astype(jnp.float32)]
    for i in range(n_emb):
        rows.append(emb_ref[:, i * d_pad:(i + 1) * d_pad].astype(jnp.float32))
    lane = jax.lax.broadcasted_iota(jnp.int32, (tb, g_pad), 1)
    flat = jnp.zeros((tb, g_pad), jnp.float32)
    for k, (r, c) in enumerate(pairs):
        v = jnp.sum(rows[r] * rows[c], axis=-1, keepdims=True)   # (tb, 1) f32
        flat = jnp.where(lane == k, v, flat)

    # ---- fused top layer 0: single K = d_pad + g_pad contraction ----
    t0 = jnp.concatenate([bottom, flat.astype(jnp.bfloat16)], axis=1)
    y = jnp.dot(t0, w0_ref[...], preferred_element_type=jnp.float32)
    y = jnp.maximum(y + b0_ref[...], 0.0).astype(jnp.bfloat16)

    # ---- middle top-MLP layers ----
    for l in range(n_top - 2):
        y = jnp.dot(y, mid[2 * l][...], preferred_element_type=jnp.float32)
        y = jnp.maximum(y + mid[2 * l + 1][...], 0.0).astype(jnp.bfloat16)

    # ---- final layer, emitted transposed => lane-dense (OUT, tb) HBM store ----
    zt = jax.lax.dot_general(wlt_ref[...], y, (((1,), (1,)), ((), ())),
                             preferred_element_type=jnp.float32)
    zt = zt + bl_ref[...]
    o_ref[0] = jax.nn.sigmoid(zt[:out_real, :]).astype(o_ref.dtype)


# ------------------------- parameter construction --------------------------

def init_dlrm_params(key, num_numerical_features, categorical_feature_sizes,
                     bottom_mlp_sizes, top_mlp_sizes, embedding_dim):
    assert embedding_dim == bottom_mlp_sizes[-1], \
        "The last bottom MLP layer must have same size as embedding."
    num_inputs = len(categorical_feature_sizes) + 1
    _ = num_inputs * (num_inputs - 1) // 2 + embedding_dim  # num_interactions

    def make_linear(k, din, dout):
        kw, kb = jax.random.split(k)
        w = jax.random.normal(kw, (din, dout), jnp.float32) * np.sqrt(2.0 / (din + dout))
        b = jax.random.normal(kb, (dout,), jnp.float32) * np.sqrt(1.0 / dout)
        return w, b

    keys = jax.random.split(key, 64)
    ki = iter(range(64))

    bottom, din = [], num_numerical_features
    for dout in bottom_mlp_sizes:
        bottom.append(make_linear(keys[next(ki)], din, dout))
        din = dout

    num_interactions = num_inputs * (num_inputs - 1) // 2 + embedding_dim
    top, din = [], num_interactions + 1
    for dout in top_mlp_sizes:
        top.append(make_linear(keys[next(ki)], din, dout))
        din = dout
    # mirrors nn.init.zeros_(self.top_mlp[0].weight[:, -1]) in (in, out) layout
    w0, b0 = top[0]
    top[0] = (w0.at[-1, :].set(0.0), b0)

    embeddings = []
    for size in categorical_feature_sizes:
        embeddings.append(
            jax.random.normal(keys[next(ki)], (size, embedding_dim), jnp.float32) * 0.05)

    return {"bottom_mlp": bottom, "top_mlp": top, "embeddings": embeddings}


def pack_dlrm_params(params, num_numerical_features):
    """Pre-pack weights: bf16 cast, lane/sublane padding, tril fold + operand
    fusion for top layer 0, transposed last layer for a lane-dense output."""
    bottom = params["bottom_mlp"]
    top = params["top_mlp"]
    tables = params["embeddings"]
    assert len(top) >= 2, "need at least two top-MLP layers"

    D = bottom[-1][0].shape[1]                 # embedding_dim
    D_pad = _round_up(D, 128)
    F = len(tables) + 1                        # bottom output + one row per table
    NT = F * (F - 1) // 2
    G_pad = _round_up(NT, 128)

    def pad_w_b(w, b, in_pad, out_pad):
        wp = jnp.pad(w, ((0, in_pad - w.shape[0]), (0, out_pad - w.shape[1])))
        bp = jnp.pad(b, (0, out_pad - b.shape[0]))
        return wp.astype(jnp.bfloat16), bp.reshape(1, out_pad).astype(jnp.float32)

    in0_pad = _round_up(num_numerical_features, 8)
    packed_bottom = []
    in_dim = in0_pad
    for w, b in bottom:
        out_dim = _round_up(w.shape[1], 128)
        packed_bottom.append(pad_w_b(w, b, in_dim, out_dim))
        in_dim = out_dim
    assert in_dim == D_pad

    # top layer 0: fold the strictly-lower-triangular selection and fuse the
    # [bottom | interactions] operands into ONE (D_pad + G_pad)-deep matmul.
    w0, b0 = top[0]                            # (D + NT + 1, H0)
    H0 = w0.shape[1]
    H0_pad = _round_up(H0, 128)
    w0_np = np.asarray(w0, np.float32)
    K0 = D_pad + G_pad
    w0f = np.zeros((K0, H0_pad), np.float32)
    w0f[:D, :H0] = w0_np[:D]
    rows_idx, cols_idx = np.tril_indices(F, k=-1)   # same ordering as torch.tril_indices
    for k in range(NT):
        w0f[D_pad + k, :H0] = w0_np[D + k]
    # Row D+NT of w0 multiplies the always-zero pad column -> dropped exactly.
    b0p = jnp.pad(b0, (0, H0_pad - H0)).reshape(1, H0_pad).astype(jnp.float32)

    packed_mid = []
    in_dim = H0_pad
    for w, b in top[1:-1]:
        out_dim = _round_up(w.shape[1], 128)
        packed_mid.append(pad_w_b(w, b, in_dim, out_dim))
        in_dim = out_dim

    # last layer stored transposed so the kernel emits a lane-dense (OUT, bb) block
    wl, bl = top[-1]
    OUT = wl.shape[1]
    OUT_rows = _round_up(OUT, 8)
    wlt = np.zeros((OUT_rows, in_dim), np.float32)
    wlt[:OUT, :wl.shape[0]] = np.asarray(wl, np.float32).T
    blp = np.zeros((OUT_rows, 1), np.float32)
    blp[:OUT, 0] = np.asarray(bl, np.float32)

    emb = [jnp.pad(t, ((0, 0), (0, D_pad - t.shape[1]))).astype(jnp.bfloat16)
           for t in tables]

    pairs = tuple(zip(rows_idx.tolist(), cols_idx.tolist()))
    meta = dict(D=D, D_pad=D_pad, F=F, NT=NT, G_pad=G_pad,
                IN0=num_numerical_features, IN0_pad=in0_pad,
                OUT=OUT, OUT_rows=OUT_rows,
                n_bottom=len(bottom), n_top=len(top), pairs=pairs)
    return dict(bottom=packed_bottom,
                w0=jnp.asarray(w0f, jnp.bfloat16), b0=b0p,
                mid=packed_mid,
                wlt=jnp.asarray(wlt, jnp.bfloat16),
                bl=jnp.asarray(blp, jnp.float32),
                embeddings=emb, meta=meta)


# --------------------------------- forward ---------------------------------

def dlrm_forward(packed, numerical_input, categorical_inputs, hash_indices=False,
                 block_b=None):
    meta = packed["meta"]
    B = numerical_input.shape[0]
    D_pad = meta["D_pad"]
    n_emb = meta["F"] - 1

    # TODO(synk): at production batch sizes, move the embedding row gather into
    # the kernel (scalar-prefetched indices + make_async_copy from HBM tables);
    # data-dependent gather is kept in plain JAX here.
    emb_outs = []
    for i, t in enumerate(packed["embeddings"]):
        idx = categorical_inputs[:, i]
        if hash_indices:
            idx = idx % t.shape[0]
        emb_outs.append(t[idx])
    emb = jnp.concatenate(emb_outs, axis=1)              # (B, n_emb*D_pad) bf16, lane-dense

    x = numerical_input.astype(jnp.bfloat16)             # kernel consumes bf16 directly
    if meta["IN0_pad"] > meta["IN0"]:
        x = jnp.pad(x, ((0, 0), (0, meta["IN0_pad"] - meta["IN0"])))

    bb = block_b if block_b is not None else _pick_block_b(B)
    grid_n = pl.cdiv(B, bb)
    B_pad = grid_n * bb
    if B_pad > B:                                        # deterministic tail rows
        x = jnp.pad(x, ((0, B_pad - B), (0, 0)))
        emb = jnp.pad(emb, ((0, B_pad - B), (0, 0)))

    inputs = [x, emb]
    in_specs = [
        pl.BlockSpec((bb, meta["IN0_pad"]), lambda i: (i, 0)),
        pl.BlockSpec((bb, n_emb * D_pad), lambda i: (i, 0)),
    ]

    def add_resident(*arrays):
        for a in arrays:
            inputs.append(a)
            # constant block index -> weight stays resident in VMEM across grid
            in_specs.append(pl.BlockSpec(a.shape, lambda i, _nd=a.ndim: (0,) * _nd))

    for w, b in packed["bottom"]:
        add_resident(w, b)
    add_resident(packed["w0"], packed["b0"])
    for w, b in packed["mid"]:
        add_resident(w, b)
    add_resident(packed["wlt"], packed["bl"])

    kernel = functools.partial(
        _dlrm_fused_kernel,
        n_bottom=meta["n_bottom"], n_top=meta["n_top"], n_emb=n_emb,
        d_pad=D_pad, g_pad=meta["G_pad"], pairs=meta["pairs"], out_real=meta["OUT"])

    out = pl.pallas_call(
        kernel,
        out_shape=jax.ShapeDtypeStruct((grid_n, meta["OUT"], bb), jnp.float32),
        grid_spec=pltpu.PrefetchScalarGridSpec(
            num_scalar_prefetch=0,
            grid=(grid_n,),
            in_specs=in_specs,
            out_specs=pl.BlockSpec((1, meta["OUT"], bb), lambda i: (i, 0, 0)),
        ),
        compiler_params=pltpu.CompilerParams(
            dimension_semantics=("parallel",),
            vmem_limit_bytes=32 * 1024 * 1024,
        ),
    )(*inputs)

    # (grid, OUT, bb) transposed blocks -> (B, OUT)
    out = jnp.transpose(out, (0, 2, 1)).reshape(B_pad, meta["OUT"])
    return out[:B]


# -------------------------- pure-JAX reference ------------------------------

def dlrm_reference(params, numerical_input, categorical_inputs, hash_indices=False,
                   use_bf16=True):
    """Reference matching DlrmBase.forward.  use_bf16=True mirrors the kernel's
    bf16-input / f32-accumulate matmul precision; False is plain f32."""
    cast = (lambda a: a.astype(jnp.bfloat16)) if use_bf16 else (lambda a: a)

    x = numerical_input.astype(jnp.float32)
    for w, b in params["bottom_mlp"]:
        x = jnp.maximum(
            jnp.dot(cast(x), cast(w), preferred_element_type=jnp.float32) + b, 0.0)
    x = cast(x).astype(jnp.float32)

    embs = []
    for i, t in enumerate(params["embeddings"]):
        idx = categorical_inputs[:, i]
        if hash_indices:
            idx = idx % t.shape[0]
        embs.append(cast(t)[idx].astype(jnp.float32))

    B = numerical_input.shape[0]
    concat = jnp.stack([x] + embs, axis=1)               # (B, F, D)
    inter = jnp.einsum("bfd,bgd->bfg", cast(concat), cast(concat),
                       preferred_element_type=jnp.float32)
    F = concat.shape[1]
    rows, cols = np.tril_indices(F, k=-1)
    flat = inter[:, rows, cols]
    y = jnp.concatenate([x, flat, jnp.zeros((B, 1), jnp.float32)], axis=1)

    top = params["top_mlp"]
    for li, (w, b) in enumerate(top):
        y = jnp.dot(cast(y), cast(w), preferred_element_type=jnp.float32) + b
        y = jax.nn.sigmoid(y) if li == len(top) - 1 else jnp.maximum(y, 0.0)
    return y


# ----------------------------------- main -----------------------------------

if __name__ == "__main__":
    # Small (but lane-friendly) DLRM config.
    B = 256
    num_numerical_features = 16
    categorical_feature_sizes = [100, 200, 300]
    embedding_dim = 128
    bottom_mlp_sizes = [256, embedding_dim]
    top_mlp_sizes = [256, 128, 1]

    key = jax.random.PRNGKey(0)
    kp, kx, kc = jax.random.split(key, 3)

    params = init_dlrm_params(kp, num_numerical_features, categorical_feature_sizes,
                              bottom_mlp_sizes, top_mlp_sizes, embedding_dim)
    packed = pack_dlrm_params(params, num_numerical_features)

    numerical_input = jax.random.normal(kx, (B, num_numerical_features), jnp.float32)
    categorical_inputs = jnp.stack(
        [jax.random.randint(jax.random.fold_in(kc, i), (B,), 0, size)
         for i, size in enumerate(categorical_feature_sizes)], axis=1).astype(jnp.int32)

    fwd = jax.jit(lambda num, cat: dlrm_forward(packed, num, cat, hash_indices=True))
    out = jax.block_until_ready(fwd(numerical_input, categorical_inputs))

    ref_bf16 = dlrm_reference(params, numerical_input, categorical_inputs,
                              hash_indices=True, use_bf16=True)
    ref_f32 = dlrm_reference(params, numerical_input, categorical_inputs,
                             hash_indices=True, use_bf16=False)
    np.testing.assert_allclose(np.asarray(out), np.asarray(ref_bf16),
                               rtol=2e-3, atol=2e-3)
    np.testing.assert_allclose(np.asarray(out), np.asarray(ref_f32),
                               rtol=2e-2, atol=2e-2)

    print("KERNEL_OK")
</pallas_src>

<mosaic_0001>
module attributes {stable_mosaic.version = 11 : i64} {
  func.func @_dlrm_fused_kernel(%arg0: i32, %arg1: memref<64x16xbf16, #tpu.memory_space<vmem>>, %arg2: memref<64x384xbf16, #tpu.memory_space<vmem>>, %arg3: memref<16x256xbf16, #tpu.memory_space<vmem>>, %arg4: memref<1x256xf32, #tpu.memory_space<vmem>>, %arg5: memref<256x128xbf16, #tpu.memory_space<vmem>>, %arg6: memref<1x128xf32, #tpu.memory_space<vmem>>, %arg7: memref<256x256xbf16, #tpu.memory_space<vmem>>, %arg8: memref<1x256xf32, #tpu.memory_space<vmem>>, %arg9: memref<256x128xbf16, #tpu.memory_space<vmem>>, %arg10: memref<1x128xf32, #tpu.memory_space<vmem>>, %arg11: memref<8x128xbf16, #tpu.memory_space<vmem>>, %arg12: memref<8x1xf32, #tpu.memory_space<vmem>>, %arg13: memref<1x1x64xf32, #tpu.memory_space<vmem>>) attributes {dimension_semantics = [#tpu.dimension_semantics<parallel>], iteration_bounds = array<i64: 4>, scalar_prefetch = 0 : i64, scratch_operands = 0 : i64, tpu.core_type = #tpu.core_type<tc>, window_params = [{transform_indices = @transform_0, window_bounds = array<i64: 64, 16>}, {transform_indices = @transform_1, window_bounds = array<i64: 64, 384>}, {pipeline_mode = #tpu.pipeline_mode<synchronous>, transform_indices = @transform_2, window_bounds = array<i64: 16, 256>}, {pipeline_mode = #tpu.pipeline_mode<synchronous>, transform_indices = @transform_3, window_bounds = array<i64: 1, 256>}, {pipeline_mode = #tpu.pipeline_mode<synchronous>, transform_indices = @transform_4, window_bounds = array<i64: 256, 128>}, {pipeline_mode = #tpu.pipeline_mode<synchronous>, transform_indices = @transform_5, window_bounds = array<i64: 1, 128>}, {pipeline_mode = #tpu.pipeline_mode<synchronous>, transform_indices = @transform_6, window_bounds = array<i64: 256, 256>}, {pipeline_mode = #tpu.pipeline_mode<synchronous>, transform_indices = @transform_7, window_bounds = array<i64: 1, 256>}, {pipeline_mode = #tpu.pipeline_mode<synchronous>, transform_indices = @transform_8, window_bounds = array<i64: 256, 128>}, {pipeline_mode = #tpu.pipeline_mode<synchronous>, transform_indices = @transform_9, window_bounds = array<i64: 1, 128>}, {pipeline_mode = #tpu.pipeline_mode<synchronous>, transform_indices = @transform_10, window_bounds = array<i64: 8, 128>}, {pipeline_mode = #tpu.pipeline_mode<synchronous>, transform_indices = @transform_11, window_bounds = array<i64: 8, 1>}, {transform_indices = @transform_12, window_bounds = array<i64: 1, 1, 64>}]} {
    %c0 = arith.constant 0 : index
    %c0_0 = arith.constant 0 : index
    %0 = vector.load %arg1[%c0, %c0_0] : memref<64x16xbf16, #tpu.memory_space<vmem>>, vector<64x16xbf16>
    %c0_1 = arith.constant 0 : index
    %c0_2 = arith.constant 0 : index
    %1 = vector.load %arg3[%c0_1, %c0_2] : memref<16x256xbf16, #tpu.memory_space<vmem>>, vector<16x256xbf16>
    %cst = arith.constant dense<0.000000e+00> : vector<64x256xf32>
    %2 = tpu.matmul %0, %1, %cst {dimension_numbers = #tpu.dot_dimension_numbers<[1], [0], [0], [1], [0, 0, 1, 1], [], []>} : vector<64x16xbf16>, vector<16x256xbf16>, vector<64x256xf32> -> vector<64x256xf32>
    %c0_3 = arith.constant 0 : index
    %c0_4 = arith.constant 0 : index
    %3 = vector.load %arg4[%c0_3, %c0_4] : memref<1x256xf32, #tpu.memory_space<vmem>>, vector<1x256xf32>
    %4 = vector.broadcast %3 : vector<1x256xf32> to vector<64x256xf32>
    %5 = arith.addf %2, %4 : vector<64x256xf32>
    %cst_5 = arith.constant 0.000000e+00 : f32
    %6 = vector.broadcast %cst_5 : f32 to vector<64x256xf32>
    %7 = arith.maximumf %5, %6 : vector<64x256xf32>
    %8 = arith.truncf %7 : vector<64x256xf32> to vector<64x256xbf16>
    %c0_6 = arith.constant 0 : index
    %c0_7 = arith.constant 0 : index
    %9 = vector.load %arg5[%c0_6, %c0_7] : memref<256x128xbf16, #tpu.memory_space<vmem>>, vector<256x128xbf16>
    %cst_8 = arith.constant dense<0.000000e+00> : vector<64x128xf32>
    %10 = tpu.matmul %8, %9, %cst_8 {dimension_numbers = #tpu.dot_dimension_numbers<[1], [0], [0], [1], [0, 0, 1, 1], [], []>} : vector<64x256xbf16>, vector<256x128xbf16>, vector<64x128xf32> -> vector<64x128xf32>
    %c0_9 = arith.constant 0 : index
    %c0_10 = arith.constant 0 : index
    %11 = vector.load %arg6[%c0_9, %c0_10] : memref<1x128xf32, #tpu.memory_space<vmem>>, vector<1x128xf32>
    %12 = vector.broadcast %11 : vector<1x128xf32> to vector<64x128xf32>
    %13 = arith.addf %10, %12 : vector<64x128xf32>
    %cst_11 = arith.constant 0.000000e+00 : f32
    %14 = vector.broadcast %cst_11 : f32 to vector<64x128xf32>
    %15 = arith.maximumf %13, %14 : vector<64x128xf32>
    %16 = arith.truncf %15 : vector<64x128xf32> to vector<64x128xbf16>
    %17 = arith.extf %16 : vector<64x128xbf16> to vector<64x128xf32>
    %c0_12 = arith.constant 0 : index
    %c0_13 = arith.constant 0 : index
    %18 = vector.load %arg2[%c0_12, %c0_13] : memref<64x384xbf16, #tpu.memory_space<vmem>>, vector<64x128xbf16>
    %19 = arith.extf %18 : vector<64x128xbf16> to vector<64x128xf32>
    %c0_14 = arith.constant 0 : index
    %c128 = arith.constant 128 : index
    %20 = vector.load %arg2[%c0_14, %c128] : memref<64x384xbf16, #tpu.memory_space<vmem>>, vector<64x128xbf16>
    %21 = arith.extf %20 : vector<64x128xbf16> to vector<64x128xf32>
    %c0_15 = arith.constant 0 : index
    %c256 = arith.constant 256 : index
    %22 = vector.load %arg2[%c0_15, %c256] : memref<64x384xbf16, #tpu.memory_space<vmem>>, vector<64x128xbf16>
    %23 = arith.extf %22 : vector<64x128xbf16> to vector<64x128xf32>
    %24 = tpu.iota {dimensions = array<i32: 1>} : vector<64x128xi32>
    %cst_16 = arith.constant 0.000000e+00 : f32
    %25 = vector.broadcast %cst_16 : f32 to vector<64x128xf32>
    %26 = arith.mulf %19, %17 : vector<64x128xf32>
    %cst_17 = arith.constant dense<0.000000e+00> : vector<64xf32>
    %27 = vector.multi_reduction <add>, %26, %cst_17 [1] : vector<64x128xf32> to vector<64xf32>
    %28 = vector.shape_cast %27 : vector<64xf32> to vector<64x1xf32>
    %c0_i32 = arith.constant 0 : i32
    %29 = vector.broadcast %c0_i32 : i32 to vector<64x128xi32>
    %30 = arith.cmpi eq, %24, %29 : vector<64x128xi32>
    %31 = vector.shape_cast %28 : vector<64x1xf32> to vector<64x1xf32>
    %32 = vector.broadcast %31 : vector<64x1xf32> to vector<64x128xf32>
    %33 = arith.select %30, %32, %25 : vector<64x128xi1>, vector<64x128xf32>
    %34 = arith.mulf %21, %17 : vector<64x128xf32>
    %cst_18 = arith.constant dense<0.000000e+00> : vector<64xf32>
    %35 = vector.multi_reduction <add>, %34, %cst_18 [1] : vector<64x128xf32> to vector<64xf32>
    %36 = vector.shape_cast %35 : vector<64xf32> to vector<64x1xf32>
    %c1_i32 = arith.constant 1 : i32
    %37 = vector.broadcast %c1_i32 : i32 to vector<64x128xi32>
    %38 = arith.cmpi eq, %24, %37 : vector<64x128xi32>
    %39 = vector.shape_cast %36 : vector<64x1xf32> to vector<64x1xf32>
    %40 = vector.broadcast %39 : vector<64x1xf32> to vector<64x128xf32>
    %41 = arith.select %38, %40, %33 : vector<64x128xi1>, vector<64x128xf32>
    %42 = arith.mulf %21, %19 : vector<64x128xf32>
    %cst_19 = arith.constant dense<0.000000e+00> : vector<64xf32>
    %43 = vector.multi_reduction <add>, %42, %cst_19 [1] : vector<64x128xf32> to vector<64xf32>
    %44 = vector.shape_cast %43 : vector<64xf32> to vector<64x1xf32>
    %c2_i32 = arith.constant 2 : i32
    %45 = vector.broadcast %c2_i32 : i32 to vector<64x128xi32>
    %46 = arith.cmpi eq, %24, %45 : vector<64x128xi32>
    %47 = vector.shape_cast %44 : vector<64x1xf32> to vector<64x1xf32>
    %48 = vector.broadcast %47 : vector<64x1xf32> to vector<64x128xf32>
    %49 = arith.select %46, %48, %41 : vector<64x128xi1>, vector<64x128xf32>
    %50 = arith.mulf %23, %17 : vector<64x128xf32>
    %cst_20 = arith.constant dense<0.000000e+00> : vector<64xf32>
    %51 = vector.multi_reduction <add>, %50, %cst_20 [1] : vector<64x128xf32> to vector<64xf32>
    %52 = vector.shape_cast %51 : vector<64xf32> to vector<64x1xf32>
    %c3_i32 = arith.constant 3 : i32
    %53 = vector.broadcast %c3_i32 : i32 to vector<64x128xi32>
    %54 = arith.cmpi eq, %24, %53 : vector<64x128xi32>
    %55 = vector.shape_cast %52 : vector<64x1xf32> to vector<64x1xf32>
    %56 = vector.broadcast %55 : vector<64x1xf32> to vector<64x128xf32>
    %57 = arith.select %54, %56, %49 : vector<64x128xi1>, vector<64x128xf32>
    %58 = arith.mulf %23, %19 : vector<64x128xf32>
    %cst_21 = arith.constant dense<0.000000e+00> : vector<64xf32>
    %59 = vector.multi_reduction <add>, %58, %cst_21 [1] : vector<64x128xf32> to vector<64xf32>
    %60 = vector.shape_cast %59 : vector<64xf32> to vector<64x1xf32>
    %c4_i32 = arith.constant 4 : i32
    %61 = vector.broadcast %c4_i32 : i32 to vector<64x128xi32>
    %62 = arith.cmpi eq, %24, %61 : vector<64x128xi32>
    %63 = vector.shape_cast %60 : vector<64x1xf32> to vector<64x1xf32>
    %64 = vector.broadcast %63 : vector<64x1xf32> to vector<64x128xf32>
    %65 = arith.select %62, %64, %57 : vector<64x128xi1>, vector<64x128xf32>
    %66 = arith.mulf %23, %21 : vector<64x128xf32>
    %cst_22 = arith.constant dense<0.000000e+00> : vector<64xf32>
    %67 = vector.multi_reduction <add>, %66, %cst_22 [1] : vector<64x128xf32> to vector<64xf32>
    %68 = vector.shape_cast %67 : vector<64xf32> to vector<64x1xf32>
    %c5_i32 = arith.constant 5 : i32
    %69 = vector.broadcast %c5_i32 : i32 to vector<64x128xi32>
    %70 = arith.cmpi eq, %24, %69 : vector<64x128xi32>
    %71 = vector.shape_cast %68 : vector<64x1xf32> to vector<64x1xf32>
    %72 = vector.broadcast %71 : vector<64x1xf32> to vector<64x128xf32>
    %73 = arith.select %70, %72, %65 : vector<64x128xi1>, vector<64x128xf32>
    %74 = arith.truncf %73 : vector<64x128xf32> to vector<64x128xbf16>
    %75 = tpu.concatenate %16, %74 in 1 : vector<64x128xbf16>, vector<64x128xbf16> -> vector<64x256xbf16>
    %c0_23 = arith.constant 0 : index
    %c0_24 = arith.constant 0 : index
    %76 = vector.load %arg7[%c0_23, %c0_24] : memref<256x256xbf16, #tpu.memory_space<vmem>>, vector<256x256xbf16>
    %cst_25 = arith.constant dense<0.000000e+00> : vector<64x256xf32>
    %77 = tpu.matmul %75, %76, %cst_25 {dimension_numbers = #tpu.dot_dimension_numbers<[1], [0], [0], [1], [0, 0, 1, 1], [], []>} : vector<64x256xbf16>, vector<256x256xbf16>, vector<64x256xf32> -> vector<64x256xf32>
    %c0_26 = arith.constant 0 : index
    %c0_27 = arith.constant 0 : index
    %78 = vector.load %arg8[%c0_26, %c0_27] : memref<1x256xf32, #tpu.memory_space<vmem>>, vector<1x256xf32>
    %79 = vector.broadcast %78 : vector<1x256xf32> to vector<64x256xf32>
    %80 = arith.addf %77, %79 : vector<64x256xf32>
    %cst_28 = arith.constant 0.000000e+00 : f32
    %81 = vector.broadcast %cst_28 : f32 to vector<64x256xf32>
    %82 = arith.maximumf %80, %81 : vector<64x256xf32>
    %83 = arith.truncf %82 : vector<64x256xf32> to vector<64x256xbf16>
    %c0_29 = arith.constant 0 : index
    %c0_30 = arith.constant 0 : index
    %84 = vector.load %arg9[%c0_29, %c0_30] : memref<256x128xbf16, #tpu.memory_space<vmem>>, vector<256x128xbf16>
    %cst_31 = arith.constant dense<0.000000e+00> : vector<64x128xf32>
    %85 = tpu.matmul %83, %84, %cst_31 {dimension_numbers = #tpu.dot_dimension_numbers<[1], [0], [0], [1], [0, 0, 1, 1], [], []>} : vector<64x256xbf16>, vector<256x128xbf16>, vector<64x128xf32> -> vector<64x128xf32>
    %c0_32 = arith.constant 0 : index
    %c0_33 = arith.constant 0 : index
    %86 = vector.load %arg10[%c0_32, %c0_33] : memref<1x128xf32, #tpu.memory_space<vmem>>, vector<1x128xf32>
    %87 = vector.broadcast %86 : vector<1x128xf32> to vector<64x128xf32>
    %88 = arith.addf %85, %87 : vector<64x128xf32>
    %cst_34 = arith.constant 0.000000e+00 : f32
    %89 = vector.broadcast %cst_34 : f32 to vector<64x128xf32>
    %90 = arith.maximumf %88, %89 : vector<64x128xf32>
    %91 = arith.truncf %90 : vector<64x128xf32> to vector<64x128xbf16>
    %c0_35 = arith.constant 0 : index
    %c0_36 = arith.constant 0 : index
    %92 = vector.load %arg11[%c0_35, %c0_36] : memref<8x128xbf16, #tpu.memory_space<vmem>>, vector<8x128xbf16>
    %cst_37 = arith.constant dense<0.000000e+00> : vector<8x64xf32>
    %93 = tpu.matmul %92, %91, %cst_37 {dimension_numbers = #tpu.dot_dimension_numbers<[1], [1], [0], [0], [0, 0, 1, 0], [], []>} : vector<8x128xbf16>, vector<64x128xbf16>, vector<8x64xf32> -> vector<8x64xf32>
    %c0_38 = arith.constant 0 : index
    %c0_39 = arith.constant 0 : index
    %94 = vector.load %arg12[%c0_38, %c0_39] : memref<8x1xf32, #tpu.memory_space<vmem>>, vector<8x1xf32>
    %95 = vector.broadcast %94 : vector<8x1xf32> to vector<8x64xf32>
    %96 = arith.addf %93, %95 : vector<8x64xf32>
    %97 = vector.extract_strided_slice %96 {offsets = [0, 0], sizes = [1, 64], strides = [1, 1]} : vector<8x64xf32> to vector<1x64xf32>
    %98 = arith.negf %97 : vector<1x64xf32>
    %99 = math.exp %98 : vector<1x64xf32>
    %cst_40 = arith.constant 1.000000e+00 : f32
    %100 = vector.broadcast %cst_40 : f32 to vector<1x64xf32>
    %101 = arith.addf %100, %99 : vector<1x64xf32>
    %102 = arith.divf %100, %101 : vector<1x64xf32>
    %c0_41 = arith.constant 0 : index
    %c0_42 = arith.constant 0 : index
    %c0_43 = arith.constant 0 : index
    %103 = vector.load %arg13[%c0_41, %c0_42, %c0_43] : memref<1x1x64xf32, #tpu.memory_space<vmem>>, vector<1x1x64xf32>
    %104 = vector.shape_cast %103 : vector<1x1x64xf32> to vector<1x64xf32>
    %105 = vector.shape_cast %102 : vector<1x64xf32> to vector<1x1x64xf32>
    tpu.vector_store %arg13[%c0_41, %c0_42, %c0_43], %105 {strides = array<i32>} : memref<1x1x64xf32, #tpu.memory_space<vmem>>, vector<1x1x64xf32>,
    return
  }
  func.func @transform_0(%arg0: i32) -> (i32, i32) {
    %c0_i32 = arith.constant 0 : i32
    %c0_i32_0 = arith.constant 0 : i32
    return %arg0, %c0_i32 : i32, i32
  }
  func.func @transform_1(%arg0: i32) -> (i32, i32) {
    %c0_i32 = arith.constant 0 : i32
    %c0_i32_0 = arith.constant 0 : i32
    return %arg0, %c0_i32 : i32, i32
  }
  func.func @transform_2(%arg0: i32) -> (i32, i32) {
    %c0_i32 = arith.constant 0 : i32
    %c0_i32_0 = arith.constant 0 : i32
    %c0_i32_1 = arith.constant 0 : i32
    return %c0_i32, %c0_i32_0 : i32, i32
  }
  func.func @transform_3(%arg0: i32) -> (i32, i32) {
    %c0_i32 = arith.constant 0 : i32
    %c0_i32_0 = arith.constant 0 : i32
    %c0_i32_1 = arith.constant 0 : i32
    return %c0_i32, %c0_i32_0 : i32, i32
  }
  func.func @transform_4(%arg0: i32) -> (i32, i32) {
    %c0_i32 = arith.constant 0 : i32
    %c0_i32_0 = arith.constant 0 : i32
    %c0_i32_1 = arith.constant 0 : i32
    return %c0_i32, %c0_i32_0 : i32, i32
  }
  func.func @transform_5(%arg0: i32) -> (i32, i32) {
    %c0_i32 = arith.constant 0 : i32
    %c0_i32_0 = arith.constant 0 : i32
    %c0_i32_1 = arith.constant 0 : i32
    return %c0_i32, %c0_i32_0 : i32, i32
  }
  func.func @transform_6(%arg0: i32) -> (i32, i32) {
    %c0_i32 = arith.constant 0 : i32
    %c0_i32_0 = arith.constant 0 : i32
    %c0_i32_1 = arith.constant 0 : i32
    return %c0_i32, %c0_i32_0 : i32, i32
  }
  func.func @transform_7(%arg0: i32) -> (i32, i32) {
    %c0_i32 = arith.constant 0 : i32
    %c0_i32_0 = arith.constant 0 : i32
    %c0_i32_1 = arith.constant 0 : i32
    return %c0_i32, %c0_i32_0 : i32, i32
  }
  func.func @transform_8(%arg0: i32) -> (i32, i32) {
    %c0_i32 = arith.constant 0 : i32
    %c0_i32_0 = arith.constant 0 : i32
    %c0_i32_1 = arith.constant 0 : i32
    return %c0_i32, %c0_i32_0 : i32, i32
  }
  func.func @transform_9(%arg0: i32) -> (i32, i32) {
    %c0_i32 = arith.constant 0 : i32
    %c0_i32_0 = arith.constant 0 : i32
    %c0_i32_1 = arith.constant 0 : i32
    return %c0_i32, %c0_i32_0 : i32, i32
  }
  func.func @transform_10(%arg0: i32) -> (i32, i32) {
    %c0_i32 = arith.constant 0 : i32
    %c0_i32_0 = arith.constant 0 : i32
    %c0_i32_1 = arith.constant 0 : i32
    return %c0_i32, %c0_i32_0 : i32, i32
  }
  func.func @transform_11(%arg0: i32) -> (i32, i32) {
    %c0_i32 = arith.constant 0 : i32
    %c0_i32_0 = arith.constant 0 : i32
    %c0_i32_1 = arith.constant 0 : i32
    return %c0_i32, %c0_i32_0 : i32, i32
  }
  func.func @transform_12(%arg0: i32) -> (i32, i32, i32) {
    %c0_i32 = arith.constant 0 : i32
    %c0_i32_0 = arith.constant 0 : i32
    %c0_i32_1 = arith.constant 0 : i32
    return %arg0, %c0_i32, %c0_i32_0 : i32, i32, i32
  }
}

</mosaic_0001>

<bundles_post_ra>
// kernel: _lambda_.1
= control target key start
LH: loop header
LB: loop body
LE: loop exit
PB: predicated region body
PF: predicated region fallthrough
CT: control target
= control target key end

     0   :  { %s2207_s21 = smov 0   ;;  %s2914_s0 = inlined_call_operand.vmem [shape: bf16[256,16], index: 0, kind: input, shape index: {}]   ;;  %s2915_s1 = inlined_call_operand.vmem [shape: bf16[256,384], index: 1, kind: input, shape index: {}]   ;;  %s2916_s2 = inlined_call_operand.vmem [shape: bf16[16,256], index: 2, kind: input, shape index: {}]   ;;  %s2917_s3 = inlined_call_operand.vmem [shape: f32[1,256], index: 3, kind: input, shape index: {}]   ;;  %s2918_s4 = inlined_call_operand.vmem [shape: bf16[256,128], index: 4, kind: input, shape index: {}]   ;;  %s2919_s5 = inlined_call_operand.vmem [shape: f32[1,128], index: 5, kind: input, shape index: {}]   ;;  %s2920_s6 = inlined_call_operand.vmem [shape: bf16[256,256], index: 6, kind: input, shape index: {}]   ;;  %s2921_s7 = inlined_call_operand.vmem [shape: f32[1,256], index: 7, kind: input, shape index: {}]   ;;  %s2922_s8 = inlined_call_operand.vmem [shape: bf16[256,128], index: 8, kind: input, shape index: {}]   ;;  %s2923_s9 = inlined_call_operand.vmem [shape: f32[1,128], index: 9, kind: input, shape index: {}]   ;;  %s2924_s10 = inlined_call_operand.vmem [shape: bf16[8,128], index: 10, kind: input, shape index: {}]   ;;  %s2925_s11 = inlined_call_operand.vmem [shape: f32[8,1], index: 11, kind: input, shape index: {}]   ;;  %s2926_s12 = inlined_call_operand.vmem [shape: f32[4,1,64], index: 12, kind: output, shape index: {}]  }
   0x1 LB: > { %s2213_s22 = sadd.s32 4294967295, %s2139_s21   ;;  %p1741_p0 = scmp.ge.s32.totalorder %s2139_s21, 1  ;;  %s2139_s21 = sphi %s2207_s21, %s22_s21  }
   0x2   : > { %p375_p1 = scmp.lt.s32.totalorder %s2139_s21, 5 }
   0x4   : > { %p376_p2 = pnand %p1741_p0, %p375_p1 }
   0x5   : > { %s1742_s13 = sshll.u32 (!%p376_p2), %s2213_s22, 3  ;;  %p434_p4 = scmp.lt.s32.totalorder (!%p376_p2), %s2213_s22, 3 }
   0x6   : > { %379 = sbr.rel (%p376_p2) target bundleno = 1002 (0x3ea), region = 68  ;;  %p422_p3 = scmp.lt.s32.totalorder (!%p376_p2), %s1742_s13, 31 }
   0xb   : > { %v1764_v0 = vld [vmem:[%s2916_s2] sm:$0xf]  ;;  %v2042_v1 = vld [vmem:[%s2916_s2 + $0x4] sm:$0xf0]  ;;  %v2041_v2 = vld [vmem:[%s2916_s2 + $0x4] sm:$0xf] }
   0xc   : > { %v1765_v3 = vor.u32 %v2042_v1, %v1764_v0  ;;  %v1766_v4 = vld [vmem:[%s2916_s2 + $0x8] sm:$0xf0]  ;;  %s2928_s13 = smov (!%p422_p3, %s1742_s13), 31  ;;  %vm484_vm0 = vcmask 130048   ;;  %v2050_v10 = vld [vmem:[%s2918_s4 + $0x38] sm:$0xff]  ;;  %v2049_v12 = vld [vmem:[%s2918_s4 + $0x30] sm:$0xff] }
   0xd   : > { %v1769_v5 = vor.u32 %v2041_v2, %v1766_v4  ;;  %s1743_s14 = sshll.u32 %s2928_s13, 2  ;;  %v2058_v11 = vld [vmem:[%s2918_s4 + $0x78] sm:$0xff]  ;;  %711 = vmatpush.bf16.msra.mxu2 %v2050_v10  ;;  %v2057_v13 = vld [vmem:[%s2918_s4 + $0x70] sm:$0xff]  ;;  %v2048_v14 = vld [vmem:[%s2918_s4 + $0x28] sm:$0xff]  ;;  %s2116_s24 = smul.u32 12, %s2928_s13  ;;  %vm1676_vm9 = vcmask 516096  }
   0xe   : > { %504 = vmatpush.bf16.msra.mxu0 %v1765_v3  ;;  %2107 = vmatpush.bf16.msra.mxu3 %v1765_v3  ;;  %s425_s17 = scalar_lea.vmem %s2914_s0, %s1743_s14  ;;  %v2056_v15 = vld [vmem:[%s2918_s4 + $0x68] sm:$0xff]  ;;  %v2047_v16 = vld [vmem:[%s2918_s4 + $0x20] sm:$0xff]  ;;  %v2046_v18 = vld [vmem:[%s2918_s4 + $0x18] sm:$0xff]  ;;  %s2930_s22 = smov (!%p434_p4, %s2213_s22), 3 }
   0xf   : > { %533 = vmatpush.bf16.msra.mxu1 %v1769_v5  ;;  %v2037_v6 = vld [vmem:[%s425_s17] sm:$0xff]  ;;  %v2039_v7 = vld [vmem:[%s425_s17 + $0x10] sm:$0xff]  ;;  %v2038_v8 = vld [vmem:[%s425_s17 + $0x8] sm:$0xff]  ;;  %s2311_s27 = scalar_lea.vmem %s2915_s1, %s2116_s24  ;;  %s436_s13 = scalar_lea.vmem %s2926_s12, %s2930_s22 }
  0x10   : > { %v2040_v9 = vld [vmem:[%s425_s17 + $0x18] sm:$0xff]  ;;  %v2055_v17 = vld [vmem:[%s2918_s4 + $0x60] sm:$0xff]  ;;  %v2045_v20 = vld [vmem:[%s2918_s4 + $0x10] sm:$0xff] }
  0x11   : > { %1770 = vmatmul.msk.bf16.vlgmr.msra.gmra.mxu0 %vm484_vm0, %v2037_v6  ;;  %1772 = vmatmul.msk.bf16.vlgmr.msra.gmra.mxu3 %vm484_vm0, %v2039_v7  ;;  %v2054_v19 = vld [vmem:[%s2918_s4 + $0x58] sm:$0xff]  ;;  %v2053_v21 = vld [vmem:[%s2918_s4 + $0x50] sm:$0xff]  ;;  %v2044_v22 = vld [vmem:[%s2918_s4 + $0x8] sm:$0xff] }
  0x12   : > { %1774 = vmatmul.msk.bf16.vlgmr.msra.gmra.mxu1 %vm484_vm0, %v2037_v6  ;;  %740 = vmatpush.bf16.msrb.mxu3 %v2058_v11  ;;  %v2052_v23 = vld [vmem:[%s2918_s4 + $0x48] sm:$0xff]  ;;  %v2043_v24 = vld [vmem:[%s2918_s4] sm:$0xff]  ;;  %v826_v2 = vld [vmem:[%s2311_s27 + $0x14] sm:$0xf] }
  0x13   : > { %712 = vmatpush.bf16.msra.mxu2 %v2049_v12  ;;  %v2051_v25 = vld [vmem:[%s2918_s4 + $0x40] sm:$0xff]  ;;  %v825_v60 = vld [vmem:[%s2311_s27 + $0x8] sm:$0xf]  ;;  %v794_v0 = vld [vmem:[%s2311_s27 + $0xc] sm:$0xff]   ;;  %v2334_v10 = vunpack.c.l.bf16 %v826_v2 }
  0x14   : > { %v448_v26 = vld [vmem:[%s2917_s3] sm:$0x3]  ;;  %v2320_v1 = vunpack.c.l.bf16 %v825_v60  ;;  %v795_v4 = vld [vmem:[%s2311_s27 + $0x18] sm:$0xff]  }
  0x15   : > { %v2295_v29 = vperm.slane %v448_v26, 0  ;;  %v2297_v30 = vperm.slane %v448_v26, 1  ;;  %v793_v59 = vld [vmem:[%s2311_s27] sm:$0xff]   ;;  %v2337_v12 = vunpack.c.l.bf16 %v795_v4  ;;  %v812_v26 = vld [vmem:[%s2311_s27 + $0x28] sm:$0xff]  }
  0x16   : > { %741 = vmatpush.bf16.msrb.mxu3 %v2057_v13  ;;  %v2315_v62 = vunpack.c.l.bf16 %v793_v59  ;;  %v2317_v63 = vunpack.c.h.bf16 %v793_v59  ;;  %v2339_v13 = vunpack.c.h.bf16 %v795_v4  ;;  %v1886_v59 = vld [vmem:[%s2920_s6 + $0x58] sm:$0xf0] }
  0x17   : > { %713 = vmatpush.bf16.msra.mxu2 %v2048_v14 }
  0x18   : > { %v909_v3 = vmul.f32 %v2317_v63, %v2315_v62 }
  0x1a   : > { %742 = vmatpush.bf16.msrb.mxu3 %v2056_v15  ;;  %917 = vadd.xlane.f32.xlu2 %v909_v3 }
  0x1b   : > { %714 = vmatpush.bf16.msra.mxu2 %v2047_v16 }
  0x1e   : > { %743 = vmatpush.bf16.msrb.mxu3 %v2055_v17 }
  0x1f   : > { %715 = vmatpush.bf16.msra.mxu2 %v2046_v18 }
  0x21   : > { %1771 = vmatmul.msk.bf16.gmra.mxu0 %vm484_vm0, %v2038_v8  ;;  %1773 = vmatmul.msk.bf16.gmra.mxu3 %vm484_vm0, %v2040_v9 }
  0x22   : > { %1775 = vmatmul.msk.bf16.gmra.mxu1 %vm484_vm0, %v2038_v8  ;;  %744 = vmatpush.bf16.msrb.mxu3 %v2054_v19  ;;  %v2330_v8 = vunpack.c.l.bf16 %v794_v0 }
  0x23   : > { %716 = vmatpush.bf16.msra.mxu2 %v2045_v20 }
  0x24   : > { %v976_v15 = vmul.f32 %v2334_v10, %v2330_v8 }
  0x26   : > { %745 = vmatpush.bf16.msrb.mxu3 %v2053_v21  ;;  %985 = vadd.xlane.f32.xlu0 %v976_v15  ;;  %v2412_v15 = vunpack.c.l.bf16 %v812_v26 }
  0x27   : > { %717 = vmatpush.bf16.msra.mxu2 %v2044_v22  ;;  %v911_v22 = vmul.f32 %v2339_v13, %v2337_v12 }
  0x2a   : > { %746 = vmatpush.bf16.msrb.mxu3 %v2052_v23  ;;  %v827_v23 = vld [vmem:[%s2311_s27 + $0x20] sm:$0xff]  }
  0x2b   : > { %718 = vmatpush.bf16.msra.mxu2 %v2043_v24 }
  0x2e   : > { %747 = vmatpush.bf16.msrb.mxu3 %v2051_v25 }
  0x32   : > { %1776 = vmatmul.msk.bf16.gmra.mxu1 %vm484_vm0, %v2039_v7  ;;  %v1008_v7 = vmul.f32 %v2320_v1, %v2317_v63 }
  0x34   : > { %1016 = vadd.xlane.f32.xlu1 %v1008_v7  ;;  %v829_v7 = vld [vmem:[%s2311_s27 + $0x38] sm:$0xff]  }
  0x3c   : > { %921 = vadd.xlane.f32.xlu1 %v911_v22  ;;  %v2068_v22 = vld [vmem:[%s2920_s6 + $0x44] sm:$0xf0] }
  0x42   : > { %1777 = vmatmul.msk.bf16.gmra.mxu1 %vm484_vm0, %v2040_v9  ;;  %v2332_v9 = vunpack.c.h.bf16 %v794_v0 }
  0x44   : > { %v910_v19 = vmul.f32 %v2332_v9, %v2330_v8  ;;  %v1009_v3 = vmul.f32 %v2334_v10, %v2332_v9 }
  0x46   : > { %919 = vadd.xlane.f32.xlu2 %v910_v19 }
  0x8e   : > { %v506_v27 = vpop.f32.mrf.mxu0 }
  0x8f   : > { %v535_v28 = vpop.f32.mrf.mxu1  ;;  %v507_v31 = vadd.f32 %v506_v27, %v2295_v29  ;;  %v2350_v27 = vunpack.c.h.bf16 %v827_v23 }
  0x90   : > { %v536_v32 = vadd.f32 %v535_v28, %v2297_v30  ;;  %v1900_v28 = vld [vmem:[%s2920_s6 + $0x70] sm:$0xf] }
  0x91   : > { %v555_v37 = vmax.f32 %v507_v31, 0.0  ;;  %v2074_v31 = vld [vmem:[%s2920_s6 + $0x74] sm:$0xf0] }
  0x92   : > { %v556_v38 = vmax.f32 %v536_v32, 0.0  ;;  %v2073_v32 = vld [vmem:[%s2920_s6 + $0x74] sm:$0xf] }
  0x94   : > { %v516_v45 = vpop.f32.mrf.mxu3 }
  0x95   : > { %v517_v5 = vadd.f32 %v516_v45, %v2295_v29 }
  0x96   : > { %v508_v33 = vpop.f32.mrf.mxu0 }
  0x97   : > { %v537_v34 = vpop.f32.mrf.mxu1  ;;  %v509_v35 = vadd.f32 %v508_v33, %v2295_v29  ;;  %v563_v16 = vmax.f32 %v517_v5, 0.0  ;;  %v2361_v33 = vunpack.c.h.bf16 %v812_v26  ;;  %v799_v26 = vld [vmem:[%s2311_s27 + $0x48] sm:$0xff]  }
  0x98   : > { %v538_v36 = vadd.f32 %v537_v34, %v2297_v30 }
  0x99   : > { %v557_v39 = vmax.f32 %v509_v35, 0.0  ;;  %v2363_v35 = vunpack.c.l.bf16 %v827_v23  ;;  %v2067_v23 = vld [vmem:[%s2920_s6 + $0x44] sm:$0xf] }
  0x9a   : > { %v558_v40 = vmax.f32 %v538_v36, 0.0  ;;  %v1901_v36 = vor.u32 %v2074_v31, %v1900_v28  ;;  %v830_v28 = vld [vmem:[%s2311_s27 + $0x40] sm:$0xff]  }
  0x9b   : > { %v571_v42 = vpack.c.bf16 %v557_v39, %v555_v37  ;;  %v1902_v37 = vld [vmem:[%s2920_s6 + $0x78] sm:$0xf0]  ;;  %v2072_v39 = vld [vmem:[%s2920_s6 + $0x64] sm:$0xf0]  ;;  %v977_v19 = vmul.f32 %v2363_v35, %v2337_v12 }
  0x9c   : > { %v572_v41 = vpack.c.bf16 %v558_v40, %v556_v38  ;;  %v518_v56 = vpop.f32.mrf.mxu3  ;;  %v1892_v38 = vld [vmem:[%s2920_s6 + $0x60] sm:$0xf]  ;;  %v1905_v40 = vor.u32 %v2073_v32, %v1902_v37  ;;  %1295 = vmatpush.bf16.msrb.mxu0 %v1901_v36  ;;  %v2438_v32 = vunpack.c.l.bf16 %v799_v26  ;;  %v2442_v36 = vunpack.c.h.bf16 %v829_v7 }
  0x9d   : > { %719 = vmatmul.bf16.vlgmr.msra.gmra.mxu2 %v571_v42  ;;  %v519_v6 = vadd.f32 %v518_v56, %v2295_v29  ;;  %v1894_v42 = vld [vmem:[%s2920_s6 + $0x68] sm:$0xf0]  ;;  %v2444_v37 = vunpack.c.h.bf16 %v830_v28 }
  0x9e   : > { %748 = vmatmul.bf16.vlgmr.msrb.gmra.mxu3 %v572_v41  ;;  %v511_v43 = vpop.f32.mrf.mxu0  ;;  %v2071_v41 = vld [vmem:[%s2920_s6 + $0x64] sm:$0xf]  ;;  %1353 = vmatpush.bf16.msrb.mxu2 %v1905_v40  ;;  %v1868_v40 = vld [vmem:[%s2920_s6 + $0x30] sm:$0xf] }
  0x9f   : > { %v540_v44 = vpop.f32.mrf.mxu1  ;;  %v512_v46 = vadd.f32 %v511_v43, %v2295_v29  ;;  %v565_v17 = vmax.f32 %v519_v6, 0.0  ;;  %v978_v43 = vmul.f32 %v2361_v33, %v2350_v27 }
  0xa0   : > { %v541_v47 = vadd.f32 %v540_v44, %v2297_v30 }
  0xa1   : > { %v559_v50 = vmax.f32 %v512_v46, 0.0  ;;  %v575_v25 = vpack.c.bf16 %v565_v17, %v563_v16  ;;  %v975_v46 = vmul.f32 %v2320_v1, %v2315_v62  ;;  %989 = vadd.xlane.f32.xlu0 %v978_v43  ;;  %v2414_v17 = vunpack.c.l.bf16 %v829_v7 }
  0xa2   : > { %v560_v51 = vmax.f32 %v541_v47, 0.0  ;;  %v1893_v47 = vor.u32 %v2072_v39, %v1892_v38  ;;  %v2446_v38 = vunpack.c.l.bf16 %v830_v28  ;;  %v980_v43 = vmul.f32 %v2444_v37, %v2442_v36 }
  0xa3   : > { %983 = vadd.xlane.f32.xlu2 %v975_v46  ;;  %v1870_v46 = vld [vmem:[%s2920_s6 + $0x38] sm:$0xf0] }
  0xa4   : > { %v521_v14 = vpop.f32.mrf.mxu3  ;;  %1296 = vmatpush.bf16.msrb.mxu0 %v1893_v47  ;;  %v1013_v7 = vmul.f32 %v2444_v37, %v2446_v38 }
  0xa6   : > { %v513_v48 = vpop.f32.mrf.mxu0 }
  0xa7   : > { %v542_v49 = vpop.f32.mrf.mxu1  ;;  %v514_v52 = vadd.f32 %v513_v48, %v2295_v29  ;;  %v1010_v48 = vmul.f32 %v2363_v35, %v2339_v13 }
  0xa8   : > { %v543_v53 = vadd.f32 %v542_v49, %v2297_v30  ;;  %v1897_v49 = vor.u32 %v2071_v41, %v1894_v42  ;;  %v2066_v41 = vld [vmem:[%s2920_s6 + $0x34] sm:$0xf0]  ;;  %v2065_v42 = vld [vmem:[%s2920_s6 + $0x34] sm:$0xf] }
  0xa9   : > { %v561_v54 = vmax.f32 %v514_v52, 0.0  ;;  %1020 = vadd.xlane.f32.xlu1 %v1010_v48  ;;  %v1873_v47 = vor.u32 %v2065_v42, %v1870_v46  ;;  %993 = vadd.xlane.f32.xlu0 %v980_v43  ;;  %v1860_v48 = vld [vmem:[%s2920_s6 + $0x20] sm:$0xf] }
  0xaa   : > { %v562_v55 = vmax.f32 %v543_v53, 0.0  ;;  %v1884_v53 = vld [vmem:[%s2920_s6 + $0x50] sm:$0xf]  ;;  %1354 = vmatpush.bf16.msrb.mxu2 %v1897_v49  ;;  %v2064_v49 = vld [vmem:[%s2920_s6 + $0x24] sm:$0xf0] }
  0xab   : > { %v573_v57 = vpack.c.bf16 %v561_v54, %v559_v50  ;;  %v797_v50 = vld [vmem:[%s2311_s27 + $0x30] sm:$0xff]   ;;  %v2070_v54 = vld [vmem:[%s2920_s6 + $0x54] sm:$0xf0]  ;;  %1018 = vadd.xlane.f32.xlu2 %v1009_v3  ;;  %v2059_v3 = vld [vmem:[%s2920_s6 + $0x4] sm:$0xf] }
  0xac   : > { %v574_v58 = vpack.c.bf16 %v562_v55, %v560_v51  ;;  %v523_v45 = vpop.f32.mrf.mxu3  ;;  %v522_v51 = vadd.f32 %v521_v14, %v2295_v29  ;;  %v2069_v55 = vld [vmem:[%s2920_s6 + $0x54] sm:$0xf] }
  0xad   : > { %724 = vmatmul.bf16.gmra.mxu2 %v573_v57  ;;  %v524_v52 = vadd.f32 %v523_v45, %v2295_v29  ;;  %v2399_v57 = vunpack.c.l.bf16 %v797_v50  ;;  %v2401_v29 = vunpack.c.h.bf16 %v797_v50  ;;  %v1889_v60 = vor.u32 %v2069_v55, %v1886_v59  ;;  %v2063_v50 = vld [vmem:[%s2920_s6 + $0x24] sm:$0xf]  ;;  %v1852_v55 = vld [vmem:[%s2920_s6 + $0x10] sm:$0xf] }
  0xae   : > { %753 = vmatmul.bf16.gmra.mxu3 %v574_v58  ;;  %v1885_v58 = vor.u32 %v2070_v54, %v1884_v53  ;;  %v1869_v45 = vor.u32 %v2066_v41, %v1868_v40 }
  0xaf   : > { %v545_v61 = vpop.f32.mrf.mxu1  ;;  %v569_v0 = vmax.f32 %v524_v52, 0.0  ;;  %v913_v6 = vmul.f32 %v2401_v29, %v2399_v57  ;;  %1355 = vmatpush.bf16.msrb.mxu2 %v1889_v60  ;;  %v1862_v52 = vld [vmem:[%s2920_s6 + $0x28] sm:$0xf0]  ;;  %v979_v54 = vmul.f32 %v2414_v17, %v2399_v57  ;;  %v1854_v60 = vld [vmem:[%s2920_s6 + $0x18] sm:$0xf0] }
  0xb0   : > { %v546_v11 = vadd.f32 %v545_v61, %v2297_v30  ;;  %v567_v61 = vmax.f32 %v522_v51, 0.0  ;;  %1297 = vmatpush.bf16.msrb.mxu0 %v1885_v58  ;;  %v1861_v51 = vor.u32 %v2064_v49, %v1860_v48  ;;  %v1865_v53 = vor.u32 %v2063_v50, %v1862_v52  ;;  %v2061_v58 = vld [vmem:[%s2920_s6 + $0x14] sm:$0xf] }
  0xb1   : > { %925 = vadd.xlane.f32.xlu1 %v913_v6 }
  0xb2   : > { %v564_v20 = vmax.f32 %v546_v11, 0.0  ;;  %v577_v14 = vpack.c.bf16 %v569_v0, %v567_v61  ;;  %v1857_v61 = vor.u32 %v2061_v58, %v1854_v60  ;;  %v1844_v0 = vld [vmem:[%s2920_s6] sm:$0xf]  ;;  %v800_v58 = vld [vmem:[%s2311_s27 + $0x54] sm:$0xff]  }
  0xb3   : > { %v2523_v60 = vunpack.c.l.bf16 %v800_v58 }
  0xb7   : > { %v547_v18 = vpop.f32.mrf.mxu1 }
  0xb8   : > { %v548_v21 = vadd.f32 %v547_v18, %v2297_v30  ;;  %v1012_v18 = vmul.f32 %v2414_v17, %v2401_v29 }
  0xba   : > { %v566_v24 = vmax.f32 %v548_v21, 0.0  ;;  %1024 = vadd.xlane.f32.xlu1 %v1012_v18  ;;  %v1876_v21 = vld [vmem:[%s2920_s6 + $0x40] sm:$0xf] }
  0xbc   : > { %v576_v34 = vpack.c.bf16 %v566_v24, %v564_v20  ;;  %v1011_v20 = vmul.f32 %v2361_v33, %v2412_v15  ;;  %v1877_v24 = vor.u32 %v2068_v22, %v1876_v21 }
  0xbd   : > { %729 = vmatmul.bf16.gmra.mxu2 %v575_v25  ;;  %v1878_v25 = vld [vmem:[%s2920_s6 + $0x48] sm:$0xf0] }
  0xbe   : > { %758 = vmatmul.bf16.gmra.mxu3 %v576_v34  ;;  %v1881_v31 = vor.u32 %v2067_v23, %v1878_v25  ;;  %v2440_v34 = vunpack.c.h.bf16 %v799_v26  ;;  %1298 = vmatpush.bf16.msrb.mxu0 %v1877_v24 }
  0xbf   : > { %v550_v44 = vpop.f32.mrf.mxu1 }
  0xc0   : > { %v551_v56 = vadd.f32 %v550_v44, %v2297_v30  ;;  %1356 = vmatpush.bf16.msrb.mxu2 %v1881_v31  ;;  %v915_v39 = vmul.f32 %v2440_v34, %v2438_v32  ;;  %v914_v44 = vmul.f32 %v2446_v38, %v2442_v36 }
  0xc2   : > { %v568_v4 = vmax.f32 %v551_v56, 0.0  ;;  %929 = vadd.xlane.f32.xlu1 %v915_v39  ;;  %1299 = vmatpush.bf16.msrb.mxu0 %v1869_v45  ;;  %v2062_v56 = vld [vmem:[%s2920_s6 + $0x14] sm:$0xf0] }
  0xc3   : > { %v1853_v59 = vor.u32 %v2062_v56, %v1852_v55 }
  0xc4   : > { %1357 = vmatpush.bf16.msrb.mxu2 %v1873_v47 }
  0xc6   : > { %1300 = vmatpush.bf16.msrb.mxu0 %v1861_v51 }
  0xc7   : > { %v552_v2 = vpop.f32.mrf.mxu1 }
  0xc8   : > { %v553_v5 = vadd.f32 %v552_v2, %v2297_v30  ;;  %v912_v30 = vmul.f32 %v2412_v15, %v2350_v27  ;;  %1358 = vmatpush.bf16.msrb.mxu2 %v1865_v53  ;;  %v2060_v2 = vld [vmem:[%s2920_s6 + $0x4] sm:$0xf0] }
  0xca   : > { %v570_v11 = vmax.f32 %v553_v5, 0.0  ;;  %923 = vadd.xlane.f32.xlu2 %v912_v30  ;;  %1301 = vmatpush.bf16.msrb.mxu0 %v1853_v59  ;;  %v1846_v5 = vld [vmem:[%s2920_s6 + $0x8] sm:$0xf0] }
  0xcb   : > { %v1849_v6 = vor.u32 %v2059_v3, %v1846_v5 }
  0xcc   : > { %v578_v16 = vpack.c.bf16 %v570_v11, %v568_v4  ;;  %1359 = vmatpush.bf16.msrb.mxu2 %v1857_v61  ;;  %v1845_v4 = vor.u32 %v2060_v2, %v1844_v0  ;;  %v2509_v11 = vld [vmem:[%s2919_s5] ss:$0 sm:$0xff]  ;;  %v2525_v61 = vunpack.c.h.bf16 %v800_v58 }
  0xcd   : > { %734 = vmatmul.bf16.gmra.mxu2 %v577_v14 }
  0xce   : > { %763 = vmatmul.bf16.gmra.mxu3 %v578_v16  ;;  %1302 = vmatpush.bf16.msrb.mxu0 %v1845_v4 }
  0xd0   : > { %1360 = vmatpush.bf16.msrb.mxu2 %v1849_v6 }
  0xd2   : > { %987 = vadd.xlane.f32.xlu2 %v977_v19 }
  0xda   : > { %1022 = vadd.xlane.f32.xlu2 %v1011_v20 }
  0xe2   : > { %927 = vadd.xlane.f32.xlu2 %v914_v44 }
  0xea   : > { %991 = vadd.xlane.f32.xlu2 %v979_v54 }
  0xf2   : > { %1026 = vadd.xlane.f32.xlu2 %v1013_v7  ;;  %v916_v7 = vmul.f32 %v2525_v61, %v2523_v60 }
 0x120   : > { %v720_v14 = vpop.f32.mrf.mxu2 }
 0x121   : > { %v749_v16 = vpop.f32.mrf.mxu3  ;;  %v721_v30 = vadd.f32 %v2509_v11, %v720_v14 }
 0x123   : > { %v750_v18 = vadd.f32 %v749_v16, %v721_v30 }
 0x125   : > { %v769_v19 = vmax.f32 %v750_v18, 0.0 }
 0x127   : > { %v777_v20 = vpack.c.bf16 %v769_v19, %v769_v19 }
 0x128   : > { %v722_v21 = vpop.f32.mrf.mxu2 }
 0x129   : > { %v751_v22 = vpop.f32.mrf.mxu3  ;;  %v785_v23 = vunpack.c.l.bf16 %v777_v20  ;;  %v723_v24 = vadd.f32 %v2509_v11, %v722_v21  ;;  %v1057_v42 = vunpack.c.l.b16 %v777_v20 }
 0x12b   : > { %v752_v25 = vadd.f32 %v751_v22, %v723_v24  ;;  %v876_v26 = vmul.f32 %v2317_v63, %v785_v23  ;;  %v843_v28 = vmul.f32 %v2315_v62, %v785_v23  ;;  %v942_v63 = vmul.f32 %v2320_v1, %v785_v23  ;;  %v831_v24 = vld [vmem:[%s2311_s27 + $0x50] sm:$0xf] }
 0x12d   : > { %v770_v31 = vmax.f32 %v752_v25, 0.0  ;;  %884 = vadd.xlane.f32.xlu1 %v876_v26  ;;  %851 = vadd.xlane.f32.xlu0 %v843_v28 }
 0x12f   : > { %v778_v39 = vpack.c.bf16 %v770_v31, %v770_v31  ;;  %v2537_v31 = vunpack.c.l.bf16 %v831_v24  ;;  %v1948_v24 = vld [vmem:[%s2920_s6 + $0xd0] sm:$0xf] }
 0x130   : > { %v725_v40 = vpop.f32.mrf.mxu2 }
 0x131   : > { %v754_v41 = vpop.f32.mrf.mxu3  ;;  %v786_v43 = vunpack.c.l.bf16 %v778_v39  ;;  %v1058_v44 = vunpack.c.l.b16 %v778_v39  ;;  %v726_v45 = vadd.f32 %v2509_v11, %v725_v40 }
 0x133   : > { %v755_v46 = vadd.f32 %v754_v41, %v726_v45  ;;  %v1065_v47 = vpack.c.b16 %v1058_v44, %v1057_v42  ;;  %v877_v48 = vmul.f32 %v2332_v9, %v786_v43  ;;  %v943_v56 = vmul.f32 %v2334_v10, %v786_v43 }
 0x134   : > { %v844_v9 = vmul.f32 %v2330_v8, %v786_v43 }
 0x135   : > { %v771_v49 = vmax.f32 %v755_v46, 0.0  ;;  %1303 = vmatmul.bf16.vlgmr.msrb.gmra.mxu0 %v1065_v47  ;;  %1361 = vmatmul.bf16.vlgmr.msrb.gmra.mxu2 %v1065_v47 }
 0x136   : > { %886 = vadd.xlane.f32.xlu1 %v877_v48  ;;  %950 = vadd.xlane.f32.xlu0 %v942_v63 }
 0x137   : > { %v779_v62 = vpack.c.bf16 %v771_v49, %v771_v49 }
 0x138   : > { %v727_v50 = vpop.f32.mrf.mxu2 }
 0x139   : > { %v756_v51 = vpop.f32.mrf.mxu3  ;;  %v787_v52 = vunpack.c.l.bf16 %v779_v62  ;;  %v728_v53 = vadd.f32 %v2509_v11, %v727_v50 }
 0x13b   : > { %v757_v54 = vadd.f32 %v756_v51, %v728_v53  ;;  %v878_v55 = vmul.f32 %v2339_v13, %v787_v52  ;;  %v1059_v13 = vunpack.c.l.b16 %v779_v62  ;;  %v845_v14 = vmul.f32 %v2337_v12, %v787_v52 }
 0x13c   : > { %v944_v12 = vmul.f32 %v2363_v35, %v787_v52  ;;  %v981_v35 = vmul.f32 %v2537_v31, %v2438_v32 }
 0x13d   : > { %v772_v1 = vmax.f32 %v757_v54, 0.0  ;;  %888 = vadd.xlane.f32.xlu2 %v878_v55 }
 0x13e   : > { %952 = vadd.xlane.f32.xlu1 %v943_v56  ;;  %853 = vadd.xlane.f32.xlu0 %v844_v9 }
 0x13f   : > { %v780_v59 = vpack.c.bf16 %v772_v1, %v772_v1  ;;  %v832_v1 = vld [vmem:[%s2311_s27 + $0x5c] sm:$0xf] }
 0x140   : > { %v730_v0 = vpop.f32.mrf.mxu2 }
 0x141   : > { %v759_v2 = vpop.f32.mrf.mxu3  ;;  %v788_v3 = vunpack.c.l.bf16 %v780_v59  ;;  %v731_v4 = vadd.f32 %v2509_v11, %v730_v0  ;;  %v1060_v5 = vunpack.c.l.b16 %v780_v59  ;;  %v2553_v0 = vpop.xlane.xlu1 %1016 }
 0x143   : > { %v760_v10 = vadd.f32 %v759_v2, %v731_v4  ;;  %v1066_v6 = vpack.c.b16 %v1060_v5, %v1059_v13  ;;  %v846_v8 = vmul.f32 %v2350_v27, %v788_v3  ;;  %v945_v23 = vmul.f32 %v2361_v33, %v788_v3  ;;  %v2090_v5 = vld [vmem:[%s2920_s6 + $0xf4] sm:$0xf0] }
 0x144   : > { %v879_v45 = vmul.f32 %v2412_v15, %v788_v3 }
 0x145   : > { %v773_v16 = vmax.f32 %v760_v10, 0.0  ;;  %1308 = vmatmul.bf16.gmra.mxu0 %v1066_v6  ;;  %1366 = vmatmul.bf16.gmra.mxu2 %v1066_v6  ;;  %v2089_v10 = vld [vmem:[%s2920_s6 + $0xf4] sm:$0xf] }
 0x146   : > { %857 = vadd.xlane.f32.xlu1 %v846_v8  ;;  %855 = vadd.xlane.f32.xlu0 %v845_v14  ;;  %v1966_v8 = vld [vmem:[%s2920_s6 + $0xf8] sm:$0xf0]  ;;  %v1014_v14 = vmul.f32 %v2537_v31, %v2440_v34 }
 0x147   : > { %v781_v30 = vpack.c.bf16 %v773_v16, %v773_v16  ;;  %931 = vadd.xlane.f32.xlu2 %v916_v7  ;;  %v1969_v7 = vor.u32 %v2089_v10, %v1966_v8 }
 0x148   : > { %v732_v18 = vpop.f32.mrf.mxu2 }
 0x149   : > { %v761_v19 = vpop.f32.mrf.mxu3  ;;  %v789_v20 = vunpack.c.l.bf16 %v781_v30  ;;  %v733_v21 = vadd.f32 %v2509_v11, %v732_v18  ;;  %v1061_v28 = vunpack.c.l.b16 %v781_v30  ;;  %v2559_v13 = vpop.xlane.xlu1 %921  ;;  %1382 = vmatpush.bf16.msra.mxu3 %v1969_v7  ;;  %v841_v7 = vlaneseq }
 0x14b   : > { %v762_v22 = vadd.f32 %v761_v19, %v733_v21  ;;  %v880_v27 = vmul.f32 %v2401_v29, %v789_v20  ;;  %v847_v52 = vmul.f32 %v2399_v57, %v789_v20  ;;  %v946_v59 = vmul.f32 %v2414_v17, %v789_v20  ;;  %v1964_v17 = vld [vmem:[%s2920_s6 + $0xf0] sm:$0xf]  ;;  %v1956_v20 = vld [vmem:[%s2920_s6 + $0xe0] sm:$0xf] }
 0x14c   : > { %v840_v57 = vunpack.c.l.bf16 %v832_v1  ;;  %v1918_v1 = vld [vmem:[%s2920_s6 + $0x98] sm:$0xf0] }
 0x14d   : > { %v774_v25 = vmax.f32 %v762_v22, 0.0  ;;  %v1958_v22 = vld [vmem:[%s2920_s6 + $0xe8] sm:$0xf0] }
 0x14e   : > { %956 = vadd.xlane.f32.xlu1 %v945_v23  ;;  %954 = vadd.xlane.f32.xlu0 %v944_v12  ;;  %v1015_v4 = vmul.f32 %v840_v57, %v2525_v61  ;;  %v2597_v23 = vpop.xlane.xlu0 %985 }
 0x14f   : > { %v782_v26 = vpack.c.bf16 %v774_v25, %v774_v25  ;;  %892 = vadd.xlane.f32.xlu2 %v880_v27  ;;  %v2086_v25 = vld [vmem:[%s2920_s6 + $0xd4] sm:$0xf0] }
 0x150   : > { %v735_v39 = vpop.f32.mrf.mxu2 }
 0x151   : > { %v764_v40 = vpop.f32.mrf.mxu3  ;;  %v790_v41 = vunpack.c.l.bf16 %v782_v26  ;;  %v736_v42 = vadd.f32 %v2509_v11, %v735_v39  ;;  %v1062_v43 = vunpack.c.l.b16 %v782_v26  ;;  %v2578_v30 = vpop.xlane.xlu1 %1020  ;;  %v2085_v26 = vld [vmem:[%s2920_s6 + $0xd4] sm:$0xf]  ;;  %v1950_v39 = vld [vmem:[%s2920_s6 + $0xd8] sm:$0xf0] }
 0x153   : > { %v765_v29 = vadd.f32 %v764_v40, %v736_v42  ;;  %v1067_v44 = vpack.c.b16 %v1062_v43, %v1061_v28  ;;  %v848_v33 = vmul.f32 %v2442_v36, %v790_v41  ;;  %v2545_v36 = vpop.xlane.xlu2 %917  ;;  %v947_v15 = vmul.f32 %v2444_v37, %v790_v41  ;;  %v1940_v42 = vld [vmem:[%s2920_s6 + $0xc0] sm:$0xf]  ;;  %v2084_v43 = vld [vmem:[%s2920_s6 + $0xc4] sm:$0xf0] }
 0x154   : > { %v881_v3 = vmul.f32 %v2446_v38, %v790_v41  ;;  %v1965_v38 = vor.u32 %v2090_v5, %v1964_v17  ;;  %v1953_v41 = vor.u32 %v2085_v26, %v1950_v39  ;;  %v2076_v17 = vld [vmem:[%s2920_s6 + $0x84] sm:$0xf0]  ;;  %v2075_v5 = vld [vmem:[%s2920_s6 + $0x84] sm:$0xf] }
 0x155   : > { %v775_v46 = vmax.f32 %v765_v29, 0.0  ;;  %1313 = vmatmul.bf16.gmra.mxu0 %v1067_v44  ;;  %1371 = vmatmul.bf16.gmra.mxu2 %v1067_v44  ;;  %v2083_v29 = vld [vmem:[%s2920_s6 + $0xc4] sm:$0xf]  ;;  %v1941_v44 = vor.u32 %v2084_v43, %v1940_v42 }
 0x156   : > { %861 = vadd.xlane.f32.xlu1 %v848_v33  ;;  %890 = vadd.xlane.f32.xlu0 %v879_v45  ;;  %v982_v33 = vmul.f32 %v840_v57, %v2523_v60 }
 0x157   : > { %v783_v47 = vpack.c.bf16 %v775_v46, %v775_v46  ;;  %995 = vadd.xlane.f32.xlu2 %v981_v35  ;;  %1324 = vmatpush.bf16.msrb.mxu1 %v1965_v38  ;;  %v2629_v46 = vpop.xlane.xlu0 %989  ;;  %v1910_v38 = vld [vmem:[%s2920_s6 + $0x88] sm:$0xf0] }
 0x158   : > { %v737_v48 = vpop.f32.mrf.mxu2  ;;  %v1913_v8 = vor.u32 %v2075_v5, %v1910_v38 }
 0x159   : > { %v766_v63 = vpop.f32.mrf.mxu3  ;;  %v791_v49 = vunpack.c.l.bf16 %v783_v47  ;;  %v738_v62 = vadd.f32 %v2509_v11, %v737_v48  ;;  %v1063_v55 = vunpack.c.l.b16 %v783_v47  ;;  %v2595_v27 = vpop.xlane.xlu1 %925  ;;  %v1932_v47 = vld [vmem:[%s2920_s6 + $0xb0] sm:$0xf]  ;;  %v2082_v48 = vld [vmem:[%s2920_s6 + $0xb4] sm:$0xf0] }
 0x15b   : > { %v767_v50 = vadd.f32 %v766_v63, %v738_v62  ;;  %v882_v51 = vmul.f32 %v2440_v34, %v791_v49  ;;  %v2555_v37 = vpop.xlane.xlu2 %919  ;;  %v849_v16 = vmul.f32 %v2438_v32, %v791_v49  ;;  %v948_v19 = vmul.f32 %v2537_v31, %v791_v49  ;;  %v2088_v34 = vld [vmem:[%s2920_s6 + $0xe4] sm:$0xf0]  ;;  %v2087_v32 = vld [vmem:[%s2920_s6 + $0xe4] sm:$0xf]  ;;  %v2081_v63 = vld [vmem:[%s2920_s6 + $0xb4] sm:$0xf] }
 0x15c   : > { %v1957_v21 = vor.u32 %v2088_v34, %v1956_v20  ;;  %v1961_v12 = vor.u32 %v2087_v32, %v1958_v22  ;;  %v1949_v31 = vor.u32 %v2086_v25, %v1948_v24  ;;  %v1933_v49 = vor.u32 %v2082_v48, %v1932_v47  ;;  %v1934_v62 = vld [vmem:[%s2920_s6 + $0xb8] sm:$0xf0] }
 0x15d   : > { %v776_v53 = vmax.f32 %v767_v50, 0.0  ;;  %v1937_v50 = vor.u32 %v2081_v63, %v1934_v62 }
 0x15e   : > { %960 = vadd.xlane.f32.xlu1 %v947_v15  ;;  %859 = vadd.xlane.f32.xlu0 %v847_v52  ;;  %v2080_v15 = vld [vmem:[%s2920_s6 + $0xa4] sm:$0xf0]  ;;  %v2079_v52 = vld [vmem:[%s2920_s6 + $0xa4] sm:$0xf] }
 0x15f   : > { %v784_v54 = vpack.c.bf16 %v776_v53, %v776_v53  ;;  %896 = vadd.xlane.f32.xlu2 %v882_v51  ;;  %1325 = vmatpush.bf16.msrb.mxu1 %v1957_v21  ;;  %v1924_v51 = vld [vmem:[%s2920_s6 + $0xa0] sm:$0xf] }
 0x160   : > { %1383 = vmatpush.bf16.msra.mxu3 %v1961_v12  ;;  %v1925_v53 = vor.u32 %v2080_v15, %v1924_v51 }
 0x161   : > { %v792_v56 = vunpack.c.l.bf16 %v784_v54  ;;  %v1064_v9 = vunpack.c.l.b16 %v784_v54  ;;  %v2627_v45 = vpop.xlane.xlu1 %1024  ;;  %v1926_v54 = vld [vmem:[%s2920_s6 + $0xa8] sm:$0xf0] }
 0x163   : > { %v1068_v58 = vpack.c.b16 %v1064_v9, %v1063_v55  ;;  %v850_v11 = vmul.f32 %v2523_v60, %v792_v56  ;;  %v949_v2 = vmul.f32 %v840_v57, %v792_v56  ;;  %v2570_v6 = vpop.xlane.xlu2 %983  ;;  %v883_v40 = vmul.f32 %v2525_v61, %v792_v56  ;;  %1326 = vmatpush.bf16.msrb.mxu1 %v1949_v31  ;;  %v1942_v61 = vld [vmem:[%s2920_s6 + $0xc8] sm:$0xf0]  ;;  %v1916_v56 = vld [vmem:[%s2920_s6 + $0x90] sm:$0xf]  ;;  %v2078_v9 = vld [vmem:[%s2920_s6 + $0x94] sm:$0xf0]  ;;  %v2671_v57 = vpop.xlane.xlu0 %993 }
 0x164   : > { %1384 = vmatpush.bf16.msra.mxu3 %v1953_v41  ;;  %v1945_v35 = vor.u32 %v2083_v29, %v1942_v61  ;;  %v1929_v55 = vor.u32 %v2079_v52, %v1926_v54 }
 0x165   : > { %1318 = vmatmul.bf16.gmra.mxu0 %v1068_v58  ;;  %1376 = vmatmul.bf16.gmra.mxu2 %v1068_v58  ;;  %v2077_v58 = vld [vmem:[%s2920_s6 + $0x94] sm:$0xf] }
 0x166   : > { %865 = vadd.xlane.f32.xlu1 %v850_v11  ;;  %958 = vadd.xlane.f32.xlu0 %v946_v59  ;;  %v1917_v11 = vor.u32 %v2078_v9, %v1916_v56 }
 0x167   : > { %1030 = vadd.xlane.f32.xlu2 %v1015_v4  ;;  %1327 = vmatpush.bf16.msrb.mxu1 %v1941_v44  ;;  %v1908_v4 = vld [vmem:[%s2920_s6 + $0x80] sm:$0xf] }
 0x168   : > { %1385 = vmatpush.bf16.msra.mxu3 %v1945_v35  ;;  %v1909_v10 = vor.u32 %v2076_v17, %v1908_v4 }
 0x169   : > { %v2669_v59 = vpop.xlane.xlu1 %929 }
 0x16b   : > { %v2580_v18 = vpop.xlane.xlu2 %1018  ;;  %1328 = vmatpush.bf16.msrb.mxu1 %v1933_v49 }
 0x16c   : > { %1386 = vmatpush.bf16.msra.mxu3 %v1937_v50 }
 0x16e   : > { %964 = vadd.xlane.f32.xlu1 %v949_v2  ;;  %894 = vadd.xlane.f32.xlu0 %v881_v3  ;;  %v1921_v2 = vor.u32 %v2077_v58, %v1918_v1 }
 0x16f   : > { %1329 = vmatpush.bf16.msrb.mxu1 %v1925_v53 }
 0x170   : > { %1387 = vmatpush.bf16.msra.mxu3 %v1929_v55 }
 0x173   : > { %v2608_v28 = vpop.xlane.xlu2 %923  ;;  %1330 = vmatpush.bf16.msrb.mxu1 %v1917_v11 }
 0x174   : > { %1388 = vmatpush.bf16.msra.mxu3 %v1921_v2 }
 0x176   : > { %863 = vadd.xlane.f32.xlu0 %v849_v16  ;;  %1028 = vadd.xlane.f32.xlu1 %v1014_v14  ;;  %v2687_v14 = vand.u32 127, %v841_v7 }
 0x177   : > { %1331 = vmatpush.bf16.msrb.mxu1 %v1909_v10 }
 0x178   : > { %1389 = vmatpush.bf16.msra.mxu3 %v1913_v8  ;;  %vm867_vm1 = vcmp.eq.s32.totalorder %v2687_v14, 0  ;;  %vm900_vm2 = vcmp.eq.s32.totalorder %v2687_v14, 1  ;;  %vm933_vm3 = vcmp.eq.s32.totalorder %v2687_v14, 2  ;;  %vm966_vm4 = vcmp.eq.s32.totalorder %v2687_v14, 3 }
 0x179   : > { %vm999_vm5 = vcmp.eq.s32.totalorder %v2687_v14, 4  ;;  %vm1032_vm6 = vcmp.eq.s32.totalorder %v2687_v14, 5  ;;  %v2092_v14 = vld [vmem:[%s2922_s8 + $0x8] sm:$0xff] }
 0x17b   : > { %v2640_v60 = vpop.xlane.xlu2 %987 }
 0x17e   : > { %962 = vadd.xlane.f32.xlu0 %v948_v19 }
 0x183   : > { %v2673_v3 = vpop.xlane.xlu2 %1022 }
 0x186   : > { %898 = vadd.xlane.f32.xlu0 %v883_v40 }
 0x18b   : > { %v2689_v20 = vpop.xlane.xlu2 %927 }
 0x18e   : > { %997 = vadd.xlane.f32.xlu0 %v982_v33 }
 0x193   : > { %v2699_v12 = vpop.xlane.xlu2 %991 }
 0x19b   : > { %v1027_v43 = vpop.xlane.xlu2 %1026 }
 0x1a0   : > { %v885_v16 = vpop.xlane.xlu1 %884  ;;  %v852_v19 = vpop.xlane.xlu0 %851 }
 0x1a1   : > { %v868_v34 = vsel %vm867_vm1, %v852_v19, 0.0 }
 0x1a2   : > { %v901_v32 = vsel %vm900_vm2, %v885_v16, %v868_v34 }
 0x1a3   : > { %v934_v24 = vsel %vm933_vm3, %v2545_v36, %v901_v32 }
 0x1a9   : > { %v951_v21 = vpop.xlane.xlu0 %950  ;;  %v887_v22 = vpop.xlane.xlu1 %886 }
 0x1aa   : > { %v967_v25 = vsel %vm966_vm4, %v951_v21, %v934_v24 }
 0x1ab   : > { %v1000_v26 = vsel %vm999_vm5, %v2570_v6, %v967_v25  ;;  %v2724_v6 = vld [vmem:[%s2921_s7] sm:$0x3] }
 0x1ac   : > { %v1033_v40 = vsel %vm1032_vm6, %v2553_v0, %v1000_v26  ;;  %v2729_v44 = vperm.slane %v2724_v6, 1 }
 0x1ad   : > { %v1041_v61 = vpack.c.bf16 %v1033_v40, %v1033_v40 }
 0x1af   : > { %v1081_v63 = vunpack.c.l.b16 %v1041_v61 }
 0x1b1   : > { %v854_v31 = vpop.xlane.xlu0 %853  ;;  %v953_v41 = vpop.xlane.xlu1 %952 }
 0x1b2   : > { %v869_v39 = vsel %vm867_vm1, %v854_v31, 0.0 }
 0x1b3   : > { %v902_v36 = vsel %vm900_vm2, %v887_v22, %v869_v39 }
 0x1b4   : > { %v935_v42 = vsel %vm933_vm3, %v2555_v37, %v902_v36 }
 0x1b5   : > { %v968_v29 = vsel %vm966_vm4, %v953_v41, %v935_v42 }
 0x1b6   : > { %v1001_v0 = vsel %vm999_vm5, %v2597_v23, %v968_v29  ;;  %v889_v23 = vpop.xlane.xlu2 %888 }
 0x1b7   : > { %v1034_v37 = vsel %vm1032_vm6, %v2580_v18, %v1001_v0 }
 0x1b8   : > { %v1362_v33 = vpop.f32.mrf.mxu2  ;;  %v1042_v35 = vpack.c.bf16 %v1034_v37, %v1034_v37 }
 0x1b9   : > { %v2738_v47 = vadd.f32 %v1362_v33, %v2729_v44  ;;  %v856_v48 = vpop.xlane.xlu0 %855  ;;  %v858_v18 = vpop.xlane.xlu1 %857 }
 0x1ba   : > { %v1082_v49 = vunpack.c.l.b16 %v1042_v35  ;;  %v870_v50 = vsel %vm867_vm1, %v856_v48, 0.0  ;;  %v871_v9 = vsel %vm867_vm1, %v858_v18, 0.0 }
 0x1bb   : > { %v903_v51 = vsel %vm900_vm2, %v889_v23, %v870_v50 }
 0x1bc   : > { %v1089_v62 = vpack.c.b16 %v1082_v49, %v1081_v63  ;;  %v936_v54 = vsel %vm933_vm3, %v2559_v13, %v903_v51 }
 0x1be   : > { %1332 = vmatmul.bf16.vlgmr.msrb.gmra.mxu1 %v1089_v62  ;;  %1390 = vmatmul.bf16.vlgmr.msra.gmra.mxu3 %v1089_v62  ;;  %v2095_v62 = vld [vmem:[%s2922_s8 + $0x20] sm:$0xff] }
 0x1c0   : > { %v1364_v15 = vpop.f32.mrf.mxu2 }
 0x1c1   : > { %v2745_v52 = vadd.f32 %v1364_v15, %v2729_v44  ;;  %v955_v53 = vpop.xlane.xlu0 %954  ;;  %v957_v2 = vpop.xlane.xlu1 %956 }
 0x1c2   : > { %v969_v55 = vsel %vm966_vm4, %v955_v53, %v936_v54 }
 0x1c3   : > { %v1002_v56 = vsel %vm999_vm5, %v2640_v60, %v969_v55  ;;  %v932_v60 = vpop.xlane.xlu2 %931 }
 0x1c4   : > { %v1035_v1 = vsel %vm1032_vm6, %v2578_v30, %v1002_v56 }
 0x1c5   : > { %v1043_v5 = vpack.c.bf16 %v1035_v1, %v1035_v1 }
 0x1c7   : > { %v1083_v8 = vunpack.c.l.b16 %v1043_v5 }
 0x1c9   : > { %v891_v58 = vpop.xlane.xlu0 %890  ;;  %v862_v19 = vpop.xlane.xlu1 %861 }
 0x1ca   : > { %v904_v11 = vsel %vm900_vm2, %v891_v58, %v871_v9  ;;  %v873_v25 = vsel %vm867_vm1, %v862_v19, 0.0  ;;  %v1304_v19 = vpop.f32.mrf.mxu0 }
 0x1cb   : > { %v937_v13 = vsel %vm933_vm3, %v2608_v28, %v904_v11  ;;  %v893_v34 = vpop.xlane.xlu2 %892 }
 0x1cc   : > { %v970_v4 = vsel %vm966_vm4, %v957_v2, %v937_v13 }
 0x1cd   : > { %v1003_v17 = vsel %vm999_vm5, %v2629_v46, %v970_v4 }
 0x1ce   : > { %v1036_v10 = vsel %vm1032_vm6, %v2673_v3, %v1003_v17 }
 0x1cf   : > { %v1044_v38 = vpack.c.bf16 %v1036_v10, %v1036_v10 }
 0x1d1   : > { %v860_v30 = vpop.xlane.xlu0 %859  ;;  %v1084_v7 = vunpack.c.l.b16 %v1044_v38  ;;  %v961_v24 = vpop.xlane.xlu1 %960  ;;  %v2093_v38 = vld [vmem:[%s2922_s8 + $0x10] sm:$0xff] }
 0x1d2   : > { %v872_v28 = vsel %vm867_vm1, %v860_v30, 0.0  ;;  %v2091_v30 = vld [vmem:[%s2922_s8] sm:$0xff] }
 0x1d3   : > { %v1090_v16 = vpack.c.b16 %v1084_v7, %v1083_v8  ;;  %v905_v46 = vsel %vm900_vm2, %v893_v34, %v872_v28  ;;  %v2106_v8 = vld [vmem:[%s2922_s8 + $0x78] sm:$0xff]  ;;  %v2105_v7 = vld [vmem:[%s2922_s8 + $0x70] sm:$0xff]  ;;  %v2103_v28 = vld [vmem:[%s2922_s8 + $0x60] sm:$0xff] }
 0x1d4   : > { %v938_v3 = vsel %vm933_vm3, %v2595_v27, %v905_v46  ;;  %2108 = vmatpush.bf16.msra.mxu1 %v2106_v8  ;;  %v2102_v34 = vld [vmem:[%s2922_s8 + $0x58] sm:$0xff]  ;;  %v2101_v46 = vld [vmem:[%s2922_s8 + $0x50] sm:$0xff] }
 0x1d5   : > { %1337 = vmatmul.bf16.gmra.mxu1 %v1090_v16  ;;  %1395 = vmatmul.bf16.gmra.mxu3 %v1090_v16  ;;  %v2104_v16 = vld [vmem:[%s2922_s8 + $0x68] sm:$0xff] }
 0x1d8   : > { %2109 = vmatpush.bf16.msra.mxu1 %v2105_v7 }
 0x1d9   : > { %v959_v32 = vpop.xlane.xlu0 %958  ;;  %v866_v37 = vpop.xlane.xlu1 %865 }
 0x1da   : > { %v971_v21 = vsel %vm966_vm4, %v959_v32, %v938_v3  ;;  %v875_v18 = vsel %vm867_vm1, %v866_v37, 0.0  ;;  %v2870_v3 = vperm.slane %v2724_v6, 0  ;;  %v2099_v6 = vld [vmem:[%s2922_s8 + $0x40] sm:$0xff] }
 0x1db   : > { %v1004_v22 = vsel %vm999_vm5, %v2699_v12, %v971_v21  ;;  %v2100_v21 = vld [vmem:[%s2922_s8 + $0x48] sm:$0xff] }
 0x1dc   : > { %v1037_v39 = vsel %vm1032_vm6, %v2627_v45, %v1004_v22  ;;  %v996_v45 = vpop.xlane.xlu2 %995  ;;  %2110 = vmatpush.bf16.msra.mxu1 %v2104_v16  ;;  %v1306_v22 = vpop.f32.mrf.mxu0 }
 0x1dd   : > { %v1045_v36 = vpack.c.bf16 %v1037_v39, %v1037_v39 }
 0x1df   : > { %v1085_v0 = vunpack.c.l.b16 %v1045_v36 }
 0x1e0   : > { %2111 = vmatpush.bf16.msra.mxu1 %v2103_v28 }
 0x1e1   : > { %v895_v26 = vpop.xlane.xlu0 %894  ;;  %v965_v49 = vpop.xlane.xlu1 %964 }
 0x1e2   : > { %v906_v31 = vsel %vm900_vm2, %v895_v26, %v873_v25  ;;  %v1307_v26 = vadd.f32 %v1306_v22, %v2870_v3 }
 0x1e3   : > { %v939_v27 = vsel %vm933_vm3, %v2689_v20, %v906_v31  ;;  %v2098_v20 = vld [vmem:[%s2922_s8 + $0x38] sm:$0xff] }
 0x1e4   : > { %v972_v40 = vsel %vm966_vm4, %v961_v24, %v939_v27  ;;  %1567 = vmatpush.bf16.msra.mxu0 %v2098_v20  ;;  %v897_v63 = vpop.xlane.xlu2 %896  ;;  %2112 = vmatpush.bf16.msra.mxu1 %v2102_v34  ;;  %v1305_v24 = vadd.f32 %v1304_v19, %v2870_v3 }
 0x1e5   : > { %v1005_v12 = vsel %vm999_vm5, %v2671_v57, %v972_v40  ;;  %v2097_v57 = vld [vmem:[%s2922_s8 + $0x30] sm:$0xff] }
 0x1e6   : > { %v1038_v41 = vsel %vm1032_vm6, %v1027_v43, %v1005_v12  ;;  %v2096_v43 = vld [vmem:[%s2922_s8 + $0x28] sm:$0xff] }
 0x1e7   : > { %v1046_v42 = vpack.c.bf16 %v1038_v41, %v1038_v41 }
 0x1e8   : > { %1568 = vmatpush.bf16.msra.mxu0 %v2097_v57  ;;  %2113 = vmatpush.bf16.msra.mxu1 %v2101_v46 }
 0x1e9   : > { %v864_v29 = vpop.xlane.xlu0 %863  ;;  %v1086_v61 = vunpack.c.l.b16 %v1046_v42  ;;  %v1029_v54 = vpop.xlane.xlu1 %1028 }
 0x1ea   : > { %v874_v48 = vsel %vm867_vm1, %v864_v29, 0.0 }
 0x1eb   : > { %v1091_v33 = vpack.c.b16 %v1086_v61, %v1085_v0  ;;  %v907_v50 = vsel %vm900_vm2, %v897_v63, %v874_v48  ;;  %v1309_v0 = vpop.f32.mrf.mxu0 }
 0x1ec   : > { %1569 = vmatpush.bf16.msra.mxu0 %v2096_v43  ;;  %v940_v23 = vsel %vm933_vm3, %v2669_v59, %v907_v50  ;;  %v1031_v9 = vpop.xlane.xlu2 %1030  ;;  %2114 = vmatpush.bf16.msra.mxu1 %v2100_v21  ;;  %v1310_v57 = vadd.f32 %v1309_v0, %v2870_v3 }
 0x1ed   : > { %1342 = vmatmul.bf16.gmra.mxu1 %v1091_v33  ;;  %1400 = vmatmul.bf16.gmra.mxu3 %v1091_v33 }
 0x1f0   : > { %1570 = vmatpush.bf16.msra.mxu0 %v2095_v62  ;;  %2115 = vmatpush.bf16.msra.mxu1 %v2099_v6 }
 0x1f1   : > { %v963_v35 = vpop.xlane.xlu0 %962 }
 0x1f2   : > { %v973_v51 = vsel %vm966_vm4, %v963_v35, %v940_v23 }
 0x1f3   : > { %v1006_v55 = vsel %vm999_vm5, %v996_v45, %v973_v51  ;;  %v1311_v33 = vpop.f32.mrf.mxu0 }
 0x1f4   : > { %v1039_v59 = vsel %vm1032_vm6, %v1029_v54, %v1006_v55  ;;  %v1312_v35 = vadd.f32 %v1311_v33, %v2870_v3 }
 0x1f5   : > { %v1047_v1 = vpack.c.bf16 %v1039_v59, %v1039_v59 }
 0x1f7   : > { %v1087_v17 = vunpack.c.l.b16 %v1047_v1 }
 0x1f9   : > { %v899_v15 = vpop.xlane.xlu0 %898 }
 0x1fa   : > { %v908_v53 = vsel %vm900_vm2, %v899_v15, %v875_v18 }
 0x1fb   : > { %v941_v56 = vsel %vm933_vm3, %v932_v60, %v908_v53  ;;  %v2094_v60 = vld [vmem:[%s2922_s8 + $0x18] sm:$0xff]  ;;  %v1314_v59 = vpop.f32.mrf.mxu0 }
 0x1fc   : > { %v974_v58 = vsel %vm966_vm4, %v965_v49, %v941_v56  ;;  %1571 = vmatpush.bf16.msra.mxu0 %v2094_v60 }
 0x200   : > { %1572 = vmatpush.bf16.msra.mxu0 %v2093_v38 }
 0x201   : > { %v998_v11 = vpop.xlane.xlu0 %997 }
 0x202   : > { %v1007_v2 = vsel %vm999_vm5, %v998_v11, %v974_v58 }
 0x203   : > { %v1040_v13 = vsel %vm1032_vm6, %v1031_v9, %v1007_v2  ;;  %v1316_v1 = vpop.f32.mrf.mxu0  ;;  %v1315_v2 = vadd.f32 %v1314_v59, %v2870_v3 }
 0x204   : > { %v1048_v4 = vpack.c.bf16 %v1040_v13, %v1040_v13  ;;  %1573 = vmatpush.bf16.msra.mxu0 %v2092_v14 }
 0x206   : > { %v1088_v5 = vunpack.c.l.b16 %v1048_v4  ;;  %v1317_v4 = vadd.f32 %v1316_v1, %v2870_v3 }
 0x208   : > { %v1092_v10 = vpack.c.b16 %v1088_v5, %v1087_v17  ;;  %1574 = vmatpush.bf16.msra.mxu0 %v2091_v30 }
 0x20a   : > { %1347 = vmatmul.bf16.gmra.mxu1 %v1092_v10  ;;  %1405 = vmatmul.bf16.gmra.mxu3 %v1092_v10 }
 0x20c   : > { %1596 = vmatpush.bf16.msrb.mxu0 %v2106_v8 }
 0x210   : > { %1597 = vmatpush.bf16.msrb.mxu0 %v2105_v7 }
 0x214   : > { %1598 = vmatpush.bf16.msrb.mxu0 %v2104_v16 }
 0x218   : > { %1599 = vmatpush.bf16.msrb.mxu0 %v2103_v28 }
 0x21c   : > { %1600 = vmatpush.bf16.msrb.mxu0 %v2102_v34 }
 0x220   : > { %1601 = vmatpush.bf16.msrb.mxu0 %v2101_v46 }
 0x224   : > { %1602 = vmatpush.bf16.msrb.mxu0 %v2100_v21  ;;  %v1319_v21 = vpop.f32.mrf.mxu0 }
 0x228   : > { %1603 = vmatpush.bf16.msrb.mxu0 %v2099_v6 }
 0x23b   : > { %v1333_v32 = vpop.f32.mrf.mxu1 }
 0x23c   : > { %v1334_v31 = vadd.f32 %v1333_v32, %v1305_v24 }
 0x23e   : > { %v1411_v12 = vmax.f32 %v1334_v31, 0.0 }
 0x241   : > { %v1391_v25 = vpop.f32.mrf.mxu3 }
 0x242   : > { %v1392_v39 = vadd.f32 %v1391_v25, %v2738_v47  ;;  %v1367_v47 = vpop.f32.mrf.mxu2  ;;  %v1321_v25 = vpop.f32.mrf.mxu0 }
 0x243   : > { %v1335_v27 = vpop.f32.mrf.mxu1 }
 0x244   : > { %v1336_v40 = vadd.f32 %v1335_v27, %v1307_v26  ;;  %v1412_v61 = vmax.f32 %v1392_v39, 0.0  ;;  %v1320_v26 = vadd.f32 %v1319_v21, %v2870_v3  ;;  %v1322_v39 = vadd.f32 %v1321_v25, %v2870_v3 }
 0x246   : > { %v1413_v36 = vmax.f32 %v1336_v40, 0.0 }
 0x248   : > { %v1427_v41 = vpack.c.bf16 %v1413_v36, %v1411_v12 }
 0x249   : > { %v1393_v42 = vpop.f32.mrf.mxu3 }
 0x24a   : > { %v1394_v29 = vadd.f32 %v1393_v42, %v2745_v52  ;;  %1575 = vmatmul.bf16.vlgmr.msra.gmra.mxu0 %v1427_v41  ;;  %v1369_v62 = vpop.f32.mrf.mxu2  ;;  %v1368_v52 = vadd.f32 %v1367_v47, %v2729_v44 }
 0x24b   : > { %v1370_v51 = vadd.f32 %v1369_v62, %v2729_v44 }
 0x24c   : > { %v1414_v45 = vmax.f32 %v1394_v29, 0.0 }
 0x24e   : > { %v2882_v37 = vpack.c.bf16 %v1414_v45, %v1412_v61 }
 0x252   : > { %v1338_v20 = vpop.f32.mrf.mxu1  ;;  %v1372_v58 = vpop.f32.mrf.mxu2 }
 0x253   : > { %v1339_v48 = vadd.f32 %v1338_v20, %v1310_v57  ;;  %v1373_v38 = vadd.f32 %v1372_v58, %v2729_v44 }
 0x255   : > { %v1415_v50 = vmax.f32 %v1339_v48, 0.0 }
 0x258   : > { %v1396_v43 = vpop.f32.mrf.mxu3 }
 0x259   : > { %v1397_v15 = vadd.f32 %v1396_v43, %v1368_v52 }
 0x25a   : > { %v1340_v63 = vpop.f32.mrf.mxu1  ;;  %v1374_v60 = vpop.f32.mrf.mxu2 }
 0x25b   : > { %v1341_v49 = vadd.f32 %v1340_v63, %v1312_v35  ;;  %v1416_v55 = vmax.f32 %v1397_v15, 0.0  ;;  %v1375_v8 = vadd.f32 %v1374_v60, %v2729_v44 }
 0x25d   : > { %v1417_v23 = vmax.f32 %v1341_v49, 0.0 }
 0x25f   : > { %v1429_v18 = vpack.c.bf16 %v1417_v23, %v1415_v50 }
 0x260   : > { %v1398_v53 = vpop.f32.mrf.mxu3 }
 0x261   : > { %v1399_v54 = vadd.f32 %v1398_v53, %v1370_v51  ;;  %1580 = vmatmul.bf16.gmra.mxu0 %v1429_v18  ;;  %v2128_v18 = vld [vmem:[%s2923_s9] ss:$0 sm:$0xff] }
 0x262   : > { %v1377_v22 = vpop.f32.mrf.mxu2 }
 0x263   : > { %v1418_v56 = vmax.f32 %v1399_v54, 0.0  ;;  %v1378_v36 = vadd.f32 %v1377_v22, %v2729_v44 }
 0x265   : > { %v1430_v9 = vpack.c.bf16 %v1418_v56, %v1416_v55 }
 0x267   : > { %1609 = vmatmul.bf16.vlgmr.msra.gmra.mxu1 %v1430_v9 }
 0x26a   : > { %v1343_v11 = vpop.f32.mrf.mxu1  ;;  %v1379_v12 = vpop.f32.mrf.mxu2 }
 0x26b   : > { %v1344_v17 = vadd.f32 %v1343_v11, %v1315_v2  ;;  %v1380_v29 = vadd.f32 %v1379_v12, %v2729_v44 }
 0x26d   : > { %v1419_v14 = vmax.f32 %v1344_v17, 0.0 }
 0x270   : > { %v1401_v13 = vpop.f32.mrf.mxu3 }
 0x271   : > { %v1402_v7 = vadd.f32 %v1401_v13, %v1373_v38 }
 0x272   : > { %v1345_v5 = vpop.f32.mrf.mxu1 }
 0x273   : > { %v1346_v10 = vadd.f32 %v1345_v5, %v1317_v4  ;;  %v1420_v34 = vmax.f32 %v1402_v7, 0.0  ;;  %v1638_v4 = vld [vmem:[%s2925_s11] sm:$0xff] }
 0x275   : > { %v1421_v30 = vmax.f32 %v1346_v10, 0.0  ;;  %v2141_v10 = vmov 0  }
 0x276   : > { %2126 = vset.pattern.permute.xlu0 %v2141_v10 }
 0x277   : > { %v1431_v16 = vpack.c.bf16 %v1421_v30, %v1419_v14  ;;  %1641 = vperm.xlu0 %2126, %v1638_v4  }
 0x278   : > { %v1403_v28 = vpop.f32.mrf.mxu3 }
 0x279   : > { %v1404_v19 = vadd.f32 %v1403_v28, %v1375_v8  ;;  %1585 = vmatmul.bf16.gmra.mxu0 %v1431_v16 }
 0x27b   : > { %v1422_v46 = vmax.f32 %v1404_v19, 0.0 }
 0x27d   : > { %v1432_v32 = vpack.c.bf16 %v1422_v46, %v1420_v34 }
 0x27f   : > { %1614 = vmatmul.bf16.gmra.mxu1 %v1432_v32 }
 0x287   : > { %v1348_v24 = vpop.f32.mrf.mxu1 }
 0x288   : > { %v1349_v6 = vadd.f32 %v1348_v24, %v1320_v26 }
 0x28a   : > { %v1423_v41 = vmax.f32 %v1349_v6, 0.0 }
 0x28d   : > { %v1406_v31 = vpop.f32.mrf.mxu3 }
 0x28e   : > { %v1407_v0 = vadd.f32 %v1406_v31, %v1378_v36  ;;  %v1637_v31 = vld [vmem:[%s2924_s10] sm:$0xf] }
 0x28f   : > { %v1350_v27 = vpop.f32.mrf.mxu1 }
 0x290   : > { %v1351_v40 = vadd.f32 %v1350_v27, %v1322_v39  ;;  %v1424_v20 = vmax.f32 %v1407_v0, 0.0 }
 0x292   : > { %v1425_v42 = vmax.f32 %v1351_v40, 0.0 }
 0x294   : > { %v1433_v61 = vpack.c.bf16 %v1425_v42, %v1423_v41 }
 0x295   : > { %v1408_v45 = vpop.f32.mrf.mxu3 }
 0x296   : > { %v1409_v47 = vadd.f32 %v1408_v45, %v1380_v29  ;;  %1590 = vmatmul.bf16.gmra.mxu0 %v1433_v61 }
 0x298   : > { %v1426_v33 = vmax.f32 %v1409_v47, 0.0 }
 0x29a   : > { %v1434_v57 = vpack.c.bf16 %v1426_v33, %v1424_v20 }
 0x29c   : > { %1619 = vmatmul.bf16.gmra.mxu1 %v1434_v57 }
 0x2a6   : > { %1604 = vmatmul.bf16.vlgmr.msrb.gmra.mxu0 %v2882_v37 }
 0x2c7   : > { %v1576_v3 = vpop.f32.mrf.mxu0 }
 0x2c8   : > { %v1577_v17 = vadd.f32 %v2128_v18, %v1576_v3 }
 0x2cf   : > { %v1578_v43 = vpop.f32.mrf.mxu0 }
 0x2d0   : > { %v1579_v60 = vadd.f32 %v2128_v18, %v1578_v43 }
 0x2de   : > { %v1581_v35 = vpop.f32.mrf.mxu0 }
 0x2df   : > { %v1582_v28 = vadd.f32 %v2128_v18, %v1581_v35 }
 0x2e4   : > { %v1610_v48 = vpop.f32.mrf.mxu1 }
 0x2e5   : > { %v1611_v21 = vadd.f32 %v1610_v48, %v1582_v28 }
 0x2e6   : > { %v1583_v63 = vpop.f32.mrf.mxu0 }
 0x2e7   : > { %v1584_v8 = vadd.f32 %v2128_v18, %v1583_v63  ;;  %v1627_v25 = vmax.f32 %v1611_v21, 0.0 }
 0x2e9   : > { %v1642_v39 = vpop.permute.xlu0 %1641 }
 0x2ec   : > { %v1612_v49 = vpop.f32.mrf.mxu1 }
 0x2ed   : > { %v1613_v19 = vadd.f32 %v1612_v49, %v1584_v8 }
 0x2ef   : > { %v1628_v24 = vmax.f32 %v1613_v19, 0.0 }
 0x2f1   : > { %v1634_v26 = vpack.c.bf16 %v1628_v24, %v1627_v25 }
 0x2f6   : > { %v1586_v62 = vpop.f32.mrf.mxu0 }
 0x2f7   : > { %v1587_v1 = vadd.f32 %v2128_v18, %v1586_v62 }
 0x2fc   : > { %v1615_v52 = vpop.f32.mrf.mxu1 }
 0x2fd   : > { %v1616_v5 = vadd.f32 %v1615_v52, %v1587_v1 }
 0x2fe   : > { %v1588_v44 = vpop.f32.mrf.mxu0 }
 0x2ff   : > { %v1589_v9 = vadd.f32 %v2128_v18, %v1588_v44  ;;  %v1629_v7 = vmax.f32 %v1616_v5, 0.0 }
 0x304   : > { %v1617_v50 = vpop.f32.mrf.mxu1 }
 0x305   : > { %v1618_v2 = vadd.f32 %v1617_v50, %v1589_v9 }
 0x307   : > { %v1630_v38 = vmax.f32 %v1618_v2, 0.0 }
 0x309   : > { %v1635_v34 = vpack.c.bf16 %v1630_v38, %v1629_v7 }
 0x313   : > { %v1591_v23 = vpop.f32.mrf.mxu0 }
 0x314   : > { %v1592_v53 = vadd.f32 %v2128_v18, %v1591_v23 }
 0x319   : > { %v1620_v51 = vpop.f32.mrf.mxu1 }
 0x31a   : > { %v1621_v54 = vadd.f32 %v1620_v51, %v1592_v53 }
 0x31b   : > { %v1593_v15 = vpop.f32.mrf.mxu0 }
 0x31c   : > { %v1594_v37 = vadd.f32 %v2128_v18, %v1593_v15  ;;  %v1631_v58 = vmax.f32 %v1621_v54, 0.0 }
 0x321   : > { %v1622_v55 = vpop.f32.mrf.mxu1 }
 0x322   : > { %v1623_v56 = vadd.f32 %v1622_v55, %v1594_v37 }
 0x323   : > { %v1605_v59 = vpop.f32.mrf.mxu0 }
 0x324   : > { %v1632_v11 = vmax.f32 %v1623_v56, 0.0  ;;  %v1606_v14 = vadd.f32 %v1605_v59, %v1577_v17 }
 0x326   : > { %v1636_v13 = vpack.c.bf16 %v1632_v11, %v1631_v58  ;;  %v1625_v46 = vmax.f32 %v1606_v14, 0.0 }
 0x328   : > { %1648 = vmatpush.bf16.xpose.msra.mxu2 %v1636_v13 }
 0x32b   : > { %v1607_v30 = vpop.f32.mrf.mxu0 }
 0x32c   : > { %v1608_v16 = vadd.f32 %v1607_v30, %v1579_v60 }
 0x32e   : > { %v1626_v32 = vmax.f32 %v1608_v16, 0.0 }
 0x330   : > { %v1633_v22 = vpack.c.bf16 %v1626_v32, %v1625_v46  ;;  %1649 = vmatpush.bf16.xpose.msra.mxu2 %v1635_v34 }
 0x338   : > { %1650 = vmatpush.bf16.xpose.msra.mxu2 %v1634_v26 }
 0x340   : > { %1651 = vmatpush.bf16.xpose.msra.mxu2 %v1633_v22 }
 0x347   : > { %1652 = vmatmul.bf16.vlgmr.msra.gmra.mxu2 %v1637_v31 }
 0x3ca   : > { %v1653_v6 = vpop.f32.mrf.mxu2 }
 0x3cb   : > { %v1654_v27 = vadd.f32 %v1653_v6, %v1642_v39 }
 0x3cd   : > { %v2034_v40 = vmul.f32 -1.442695, %v1654_v27 }
 0x3cf   : > { %2129 = vpow2.f32 %v2034_v40 }
 0x3d2   : > { %v1655_v12 = vpop.f32.mrf.mxu2 }
 0x3d5   : > { %v2130_v36 = vpop.eup %2129 }
 0x3d6   : > { %v1660_v41 = vadd.f32 1.0, %v2130_v36 }
 0x3d8   : > { %2131 = vrcp.f32 %v1660_v41  ;;  %v1672_v61 = vand.u32 2147483648, %v1660_v41  ;;  %v1670_v47 = vand.u32 2147483647, %v1660_v41  ;;  %vm1666_vm8 = vweird.f32 %v1660_v41 }
 0x3da   : > { %v1673_v33 = vor.u32 1.1754944e-38, %v1672_v61  ;;  %vm1671_vm11 = vcmp.eq.f32.partialorder %v1670_v47, 8.507059e+37 }
 0x3de   : > { %v2132_v42 = vpop.eup %2131 }
 0x3df   : > { %v1662_v29 = vmul.f32 %v2132_v42, %v1660_v41  ;;  %vm1667_vm7 = vweird.f32 %v2132_v42 }
 0x3e0   : > { %vm1668_vm10 = vmor %vm1666_vm8, %vm1667_vm7 }
 0x3e1   : > { %v1663_v0 = vsub.f32 1.0, %v1662_v29 }
 0x3e3   : > { %v1664_v45 = vmul.f32 %v2132_v42, %v1663_v0 }
 0x3e5   : > { %v1665_v20 = vadd.f32 %v2132_v42, %v1664_v45 }
 0x3e7   : > { %v1669_v57 = vsel %vm1668_vm10, %v2132_v42, %v1665_v20 }
 0x3e8   : > { %v1674_v3 = vsel %vm1671_vm11, %v1673_v33, %v1669_v57 }
 0x3e9   : > { %1677 = vst.msk [vmem:[%s436_s13] sm:$0x1] %vm1676_vm9, %v1674_v3 }
 0x3ea PF: > { %s22_s21 = sadd.s32 1, %s2139_s21  }
 0x3eb   : > { %p19_p5 = scmp.ge.s32.totalorder %s22_s21, 6  }
 0x3ed   :  { %21 = sbr.rel (!%p19_p5) target bundleno = 1 (0x1), region = 101 }

</bundles_post_ra>
